<compile_context>
chip_gen: v5e
topology: v5e:2x2
jax: 0.10.0
libtpu: 0.0.40
codegen_flags: <defaults>
</compile_context>

<pallas_src>
import functools

import jax
import jax.numpy as jnp
import numpy as np
from jax.experimental import pallas as pl
from jax.experimental.pallas import tpu as pltpu


def scnet_kernel(bb_ref, zb_ref, z_ref, b_ref, mask_ref, prm_ref,
                 xest_ref, lpart_ref, *, num_layer, in_dim, sub_connected):
    """Batch-in-lanes ScNet forward for one batch tile.

    bb_ref   : (D, D, bm) bf16   BB re-laid out (BB[n,i,j] -> bb[i,j,n])
    zb_ref   : (D, bm)    f32
    z_ref    : (M, bm)    f32
    b_ref    : (D, M, bm) bf16
    mask_ref : (D, bm)    f32
    prm_ref  : (D, 3*L)   f32    columns [3l+0]=W1, [3l+1]=W2, [3l+2]=C
                                 (VectorLinear1/2 + eval BN + the *2 of the
                                  clamp folded together in the wrapper)
    xest_ref : (D, bm)    f32
    lpart_ref: (1, L, bm) f32    per-layer, per-lane partial sums of diff^2
    """
    zb = zb_ref[...]
    zz = z_ref[...]
    mask = mask_ref[...]

    x_est = jnp.zeros_like(zb)
    bbprod = None                                  # set at end of layer l-1
    for l in range(num_layer):                     # small, static -> unrolled
        w1 = prm_ref[:, 3 * l + 0:3 * l + 1]       # (D, 1), lane-broadcast
        w2 = prm_ref[:, 3 * l + 1:3 * l + 2]
        cc = prm_ref[:, 3 * l + 2:3 * l + 3]

        # aux = x_est @ BB - zB (per sample); x_est == 0 at l == 0.
        aux = -zb if l == 0 else bbprod - zb
        lin_in = aux * mask if sub_connected else aux
        if l == 0:
            out = lin_in * w1 + cc                 # x_est term is zero
        else:
            out = lin_in * w1 + x_est * w2 + cc
        # -1 + relu(x+.5)/.5 - relu(x-.5)/.5 == clip(2x, -1, 1); the 2 is
        # already folded into w1/w2/cc.
        x_est = jnp.clip(out * mask, -1.0, 1.0)

        # pred[m,n]   = sum_i x_est[i,n] * B[i,m,n]    (loss prediction)
        # bbprod[j,n] = sum_i x_est[i,n] * BB[i,j,n]   (next layer's aux)
        # Accumulate over the leading (untiled) axis; per-slab bf16 load +
        # upcast keeps vreg pressure low; one x_est slice feeds both products.
        need_bb = (l + 1 < num_layer)
        pacc = jnp.zeros_like(zz)                  # (M, bm) f32
        bbacc = jnp.zeros_like(zb) if need_bb else None
        for i in range(in_dim):
            xi = x_est[i:i + 1, :]                 # (1, bm)
            pacc = pacc + xi * b_ref[i].astype(jnp.float32)
            if need_bb:
                bbacc = bbacc + xi * bb_ref[i].astype(jnp.float32)
        if need_bb:
            bbprod = bbacc

        diff = zz - pacc
        lpart_ref[0, l:l + 1, :] = jnp.sum(diff * diff, axis=0, keepdims=True)

    xest_ref[...] = x_est


def _vmem_capacity_bytes():
    try:
        fn = getattr(pltpu, "get_tpu_info", None)
        if fn is not None:
            return int(fn().vmem_capacity_bytes)
    except Exception:
        pass
    return 64 * 1024 * 1024                        # v7x-safe default


def _pick_block_cols(n, d, m, num_layer, vmem_cap):
    """Largest lane-dense batch tile (multiple of 128 dividing n) in budget."""
    per_col = (2 * 2 * (d * d + d * m)             # BB + B, bf16, double-buffered
               + 2 * 4 * (3 * d + m + num_layer))  # zB/mask/x_est, z, loss (f32)
    budget = int(vmem_cap * 0.45)                  # headroom for scratch/regalloc
    cap = max(128, budget // max(per_col, 1))
    if n >= 256:
        cap = min(cap, n // 2)                     # >=2 grid steps for v7x megacore
    c = (min(cap, n) // 128) * 128
    while c >= 128:
        if n % c == 0:
            return c
        c -= 128
    return n                                       # full-extent last dim is legal


def scnet_forward(params, BB, zB, z, B, mask, *, loss_scalar=1.0,
                  sub_connected=False, block_cols=None):
    """x_est, LOSS = ScNet(BB, zB, z, B, Mask) (eval-mode BN, unsupervised)."""
    N, D = zB.shape
    M = z.shape[1]
    L = params["w1"].shape[0]

    # Fold VectorLinear1/2 + eval-mode BatchNorm + the *2 of the clamp into
    # three per-feature vectors per layer: out2 = aux*W1 + x_est*W2 + C.
    s, t = params["bn_scale"], params["bn_shift"]
    W1 = 2.0 * params["w1"] * s
    W2 = 2.0 * params["w2"] * s
    C = 2.0 * ((params["b1"] + params["b2"]) * s + t)
    packed = jnp.stack([W1, W2, C], axis=1).astype(jnp.float32)   # (L, 3, D)
    packed = packed.reshape(3 * L, D).T                           # (D, 3L)

    # One-time XLA re-layout: batch into the minor (lane) axis; bf16 for the
    # two big operands (halves HBM bytes); f32 accumulation in-kernel.
    BBt = jnp.transpose(BB, (1, 2, 0)).astype(jnp.bfloat16)       # (D, D, N)
    Bt = jnp.transpose(B, (1, 2, 0)).astype(jnp.bfloat16)         # (D, M, N)
    zBt = zB.T.astype(jnp.float32)                                # (D, N)
    zt = z.T.astype(jnp.float32)                                  # (M, N)
    maskt = mask.T.astype(jnp.float32)                            # (D, N)

    vmem_cap = _vmem_capacity_bytes()
    bm = block_cols if block_cols is not None else _pick_block_cols(
        N, D, M, L, vmem_cap)
    assert N % bm == 0, "batch must be divisible by block_cols"
    grid = (N // bm,)

    in_specs = [
        pl.BlockSpec((D, D, bm), lambda i: (0, 0, i)),    # BB^T
        pl.BlockSpec((D, bm), lambda i: (0, i)),          # zB^T
        pl.BlockSpec((M, bm), lambda i: (0, i)),          # z^T
        pl.BlockSpec((D, M, bm), lambda i: (0, 0, i)),    # B^T
        pl.BlockSpec((D, bm), lambda i: (0, i)),          # Mask^T
        pl.BlockSpec((D, 3 * L), lambda i: (0, 0)),       # folded params
    ]
    out_specs = (
        pl.BlockSpec((D, bm), lambda i: (0, i)),          # x_est (D, N)
        pl.BlockSpec((1, L, bm), lambda i: (i, 0, 0)),    # loss partials
    )
    out_shape = (
        jax.ShapeDtypeStruct((D, N), jnp.float32),
        jax.ShapeDtypeStruct((grid[0], L, bm), jnp.float32),
    )

    flops = int(L * N * (2 * D * (D + M) + 10 * D + 3 * M))
    bytes_accessed = int(2 * N * D * (D + M)             # BB + B (bf16, read once)
                         + 4 * N * (4 * D + M)           # zB, z, mask, x_est (f32)
                         + 4 * N * L + 4 * D * 3 * L)    # loss partials, params
    cost = pl.CostEstimate(flops=flops, transcendentals=0,
                           bytes_accessed=bytes_accessed)

    x_est_t, lpart = pl.pallas_call(
        functools.partial(scnet_kernel, num_layer=L, in_dim=D,
                          sub_connected=sub_connected),
        grid=grid,
        in_specs=in_specs,
        out_specs=out_specs,
        out_shape=out_shape,
        compiler_params=pltpu.CompilerParams(
            dimension_semantics=("parallel",),
            vmem_limit_bytes=min(int(vmem_cap * 0.75), 100 * 1024 * 1024)),
        cost_estimate=cost,
    )(BBt, zBt, zt, Bt, maskt, packed)

    # LOSS[l] = Loss_scalar * log(l+1) * mean(diff_l^2)   (mean over N*M elems)
    coeff = jnp.asarray(loss_scalar * np.log(np.arange(1, L + 1)), jnp.float32)
    losses = coeff * lpart.sum(axis=(0, 2)) / float(N * M)
    return x_est_t.T, losses


def scnet_reference(params, BB, zB, z, B, mask, *, loss_scalar=1.0,
                    sub_connected=False):
    """Pure-JAX reference mirroring the PyTorch forward (eval-mode BN)."""
    L = params["w1"].shape[0]
    N, D = zB.shape
    x_est = jnp.zeros((N, D), jnp.float32)
    losses = []
    for l in range(L):
        aux = jnp.einsum('ni,nij->nj', x_est, BB) - zB
        lin_in = aux * mask if sub_connected else aux
        out = (lin_in * params["w1"][l] + params["b1"][l]
               + x_est * params["w2"][l] + params["b2"][l])
        out = out * params["bn_scale"][l] + params["bn_shift"][l]
        xm = out * mask
        x_est = (-1.0 + jax.nn.relu(xm + 0.5) / 0.5
                 - jax.nn.relu(xm - 0.5) / 0.5)
        pred = jnp.einsum('ni,nim->nm', x_est, B)
        dis = jnp.mean((z - pred) ** 2)
        losses.append(loss_scalar * np.log(l + 1) * dis)
    return x_est, jnp.stack(losses)


def init_params(key, dim, num_layer, eps=1e-5):
    ks = jax.random.split(key, 8)
    shp = (num_layer, dim)
    # VectorLinear init in torch is N(0, 0.01); larger std here so the test
    # exercises the clamp nonlinearity.
    w1 = 0.5 * jax.random.normal(ks[0], shp, jnp.float32)
    b1 = 0.5 * jax.random.normal(ks[1], shp, jnp.float32)
    w2 = 0.5 * jax.random.normal(ks[2], shp, jnp.float32)
    b2 = 0.5 * jax.random.normal(ks[3], shp, jnp.float32)
    # BatchNorm1d folded to eval-mode affine from (randomized) running stats.
    gamma = 1.0 + 0.1 * jax.random.normal(ks[4], shp, jnp.float32)
    beta = 0.1 * jax.random.normal(ks[5], shp, jnp.float32)
    mean = 0.1 * jax.random.normal(ks[6], shp, jnp.float32)
    var = jnp.abs(1.0 + 0.1 * jax.random.normal(ks[7], shp, jnp.float32))
    scale = gamma / jnp.sqrt(var + eps)
    shift = beta - mean * scale
    return {"w1": w1, "b1": b1, "w2": w2, "b2": b2,
            "bn_scale": scale, "bn_shift": shift}


if __name__ == "__main__":
    D, M, L, N = 16, 8, 3, 256       # in_dim, z width, num_layer, batch
    key = jax.random.PRNGKey(0)
    kp, kbb, kzb, kz, kb, km = jax.random.split(key, 6)
    params = init_params(kp, D, L)

    BB = 0.3 * jax.random.normal(kbb, (N, D, D), jnp.float32)
    zB = jax.random.normal(kzb, (N, D), jnp.float32)
    z = jax.random.normal(kz, (N, M), jnp.float32)
    B = jax.random.normal(kb, (N, D, M), jnp.float32)
    mask = (jax.random.uniform(km, (N, D)) > 0.3).astype(jnp.float32)
    # x (supervised target) is unused: only the 'unsupervised' loss is runnable.

    x_est, losses = scnet_forward(params, BB, zB, z, B, mask, loss_scalar=1.0)
    jax.block_until_ready((x_est, losses))

    # Reference on bf16-rounded BB/B (the kernel intentionally stores the two
    # big operands as bf16 in HBM; all arithmetic is f32 on both sides).
    BBq = BB.astype(jnp.bfloat16).astype(jnp.float32)
    Bq = B.astype(jnp.bfloat16).astype(jnp.float32)
    x_ref, loss_ref = scnet_reference(params, BBq, zB, z, Bq, mask,
                                      loss_scalar=1.0)
    assert np.allclose(np.asarray(x_est), np.asarray(x_ref),
                       rtol=1e-4, atol=1e-4), "x_est mismatch"
    assert np.allclose(np.asarray(losses), np.asarray(loss_ref),
                       rtol=1e-4, atol=1e-5), "loss mismatch"

    print("KERNEL_OK")
</pallas_src>

<mosaic_0001>
module attributes {stable_mosaic.version = 11 : i64} {
  func.func @scnet_kernel(%arg0: i32, %arg1: memref<16x16x128xbf16, #tpu.memory_space<vmem>>, %arg2: memref<16x128xf32, #tpu.memory_space<vmem>>, %arg3: memref<8x128xf32, #tpu.memory_space<vmem>>, %arg4: memref<16x8x128xbf16, #tpu.memory_space<vmem>>, %arg5: memref<16x128xf32, #tpu.memory_space<vmem>>, %arg6: memref<16x9xf32, #tpu.memory_space<vmem>>, %arg7: memref<16x128xf32, #tpu.memory_space<vmem>>, %arg8: memref<1x3x128xf32, #tpu.memory_space<vmem>>) attributes {dimension_semantics = [#tpu.dimension_semantics<parallel>], iteration_bounds = array<i64: 2>, scalar_prefetch = 0 : i64, scratch_operands = 0 : i64, tpu.core_type = #tpu.core_type<tc>, window_params = [{transform_indices = @transform_0, window_bounds = array<i64: 16, 16, 128>}, {transform_indices = @transform_1, window_bounds = array<i64: 16, 128>}, {transform_indices = @transform_2, window_bounds = array<i64: 8, 128>}, {transform_indices = @transform_3, window_bounds = array<i64: 16, 8, 128>}, {transform_indices = @transform_4, window_bounds = array<i64: 16, 128>}, {pipeline_mode = #tpu.pipeline_mode<synchronous>, transform_indices = @transform_5, window_bounds = array<i64: 16, 9>}, {transform_indices = @transform_6, window_bounds = array<i64: 16, 128>}, {transform_indices = @transform_7, window_bounds = array<i64: 1, 3, 128>}]} {
    %c0 = arith.constant 0 : index
    %c0_0 = arith.constant 0 : index
    %0 = vector.load %arg2[%c0, %c0_0] : memref<16x128xf32, #tpu.memory_space<vmem>>, vector<16x128xf32>
    %c0_1 = arith.constant 0 : index
    %c0_2 = arith.constant 0 : index
    %1 = vector.load %arg3[%c0_1, %c0_2] : memref<8x128xf32, #tpu.memory_space<vmem>>, vector<8x128xf32>
    %c0_3 = arith.constant 0 : index
    %c0_4 = arith.constant 0 : index
    %2 = vector.load %arg5[%c0_3, %c0_4] : memref<16x128xf32, #tpu.memory_space<vmem>>, vector<16x128xf32>
    %c0_5 = arith.constant 0 : index
    %c0_6 = arith.constant 0 : index
    %3 = vector.load %arg6[%c0_5, %c0_6] : memref<16x9xf32, #tpu.memory_space<vmem>>, vector<16x1xf32>
    %c0_7 = arith.constant 0 : index
    %c2 = arith.constant 2 : index
    %4 = vector.load %arg6[%c0_7, %c2] : memref<16x9xf32, #tpu.memory_space<vmem>>, vector<16x1xf32>
    %cst = arith.constant 0.000000e+00 : f32
    %5 = vector.broadcast %cst : f32 to vector<16x128xf32>
    %6 = arith.subf %5, %0 : vector<16x128xf32>
    %7 = vector.broadcast %3 : vector<16x1xf32> to vector<16x128xf32>
    %8 = arith.mulf %6, %7 : vector<16x128xf32>
    %9 = vector.broadcast %4 : vector<16x1xf32> to vector<16x128xf32>
    %10 = arith.addf %8, %9 : vector<16x128xf32>
    %11 = arith.mulf %10, %2 : vector<16x128xf32>
    %cst_8 = arith.constant -1.000000e+00 : f32
    %cst_9 = arith.constant 1.000000e+00 : f32
    %12 = vector.broadcast %cst_8 : f32 to vector<16x128xf32>
    %13 = arith.maximumf %12, %11 : vector<16x128xf32>
    %14 = vector.broadcast %cst_9 : f32 to vector<16x128xf32>
    %15 = arith.minimumf %14, %13 : vector<16x128xf32>
    %cst_10 = arith.constant 0.000000e+00 : f32
    %16 = vector.broadcast %cst_10 : f32 to vector<8x128xf32>
    %cst_11 = arith.constant 0.000000e+00 : f32
    %17 = vector.broadcast %cst_11 : f32 to vector<16x128xf32>
    %18 = vector.extract_strided_slice %15 {offsets = [0, 0], sizes = [1, 128], strides = [1, 1]} : vector<16x128xf32> to vector<1x128xf32>
    %c0_12 = arith.constant 0 : index
    %c0_13 = arith.constant 0 : index
    %c0_14 = arith.constant 0 : index
    %19 = vector.load %arg4[%c0_12, %c0_13, %c0_14] : memref<16x8x128xbf16, #tpu.memory_space<vmem>>, vector<1x8x128xbf16>
    %20 = vector.shape_cast %19 : vector<1x8x128xbf16> to vector<8x128xbf16>
    %21 = arith.extf %20 : vector<8x128xbf16> to vector<8x128xf32>
    %22 = vector.broadcast %18 : vector<1x128xf32> to vector<8x128xf32>
    %23 = arith.mulf %22, %21 : vector<8x128xf32>
    %24 = arith.addf %16, %23 : vector<8x128xf32>
    %c0_15 = arith.constant 0 : index
    %c0_16 = arith.constant 0 : index
    %c0_17 = arith.constant 0 : index
    %25 = vector.load %arg1[%c0_15, %c0_16, %c0_17] : memref<16x16x128xbf16, #tpu.memory_space<vmem>>, vector<1x16x128xbf16>
    %26 = vector.shape_cast %25 : vector<1x16x128xbf16> to vector<16x128xbf16>
    %27 = arith.extf %26 : vector<16x128xbf16> to vector<16x128xf32>
    %28 = vector.broadcast %18 : vector<1x128xf32> to vector<16x128xf32>
    %29 = arith.mulf %28, %27 : vector<16x128xf32>
    %30 = arith.addf %17, %29 : vector<16x128xf32>
    %31 = vector.extract_strided_slice %15 {offsets = [1, 0], sizes = [1, 128], strides = [1, 1]} : vector<16x128xf32> to vector<1x128xf32>
    %c1 = arith.constant 1 : index
    %c0_18 = arith.constant 0 : index
    %c0_19 = arith.constant 0 : index
    %32 = vector.load %arg4[%c1, %c0_18, %c0_19] : memref<16x8x128xbf16, #tpu.memory_space<vmem>>, vector<1x8x128xbf16>
    %33 = vector.shape_cast %32 : vector<1x8x128xbf16> to vector<8x128xbf16>
    %34 = arith.extf %33 : vector<8x128xbf16> to vector<8x128xf32>
    %35 = vector.broadcast %31 : vector<1x128xf32> to vector<8x128xf32>
    %36 = arith.mulf %35, %34 : vector<8x128xf32>
    %37 = arith.addf %24, %36 : vector<8x128xf32>
    %c1_20 = arith.constant 1 : index
    %c0_21 = arith.constant 0 : index
    %c0_22 = arith.constant 0 : index
    %38 = vector.load %arg1[%c1_20, %c0_21, %c0_22] : memref<16x16x128xbf16, #tpu.memory_space<vmem>>, vector<1x16x128xbf16>
    %39 = vector.shape_cast %38 : vector<1x16x128xbf16> to vector<16x128xbf16>
    %40 = arith.extf %39 : vector<16x128xbf16> to vector<16x128xf32>
    %41 = vector.broadcast %31 : vector<1x128xf32> to vector<16x128xf32>
    %42 = arith.mulf %41, %40 : vector<16x128xf32>
    %43 = arith.addf %30, %42 : vector<16x128xf32>
    %44 = vector.extract_strided_slice %15 {offsets = [2, 0], sizes = [1, 128], strides = [1, 1]} : vector<16x128xf32> to vector<1x128xf32>
    %c2_23 = arith.constant 2 : index
    %c0_24 = arith.constant 0 : index
    %c0_25 = arith.constant 0 : index
    %45 = vector.load %arg4[%c2_23, %c0_24, %c0_25] : memref<16x8x128xbf16, #tpu.memory_space<vmem>>, vector<1x8x128xbf16>
    %46 = vector.shape_cast %45 : vector<1x8x128xbf16> to vector<8x128xbf16>
    %47 = arith.extf %46 : vector<8x128xbf16> to vector<8x128xf32>
    %48 = vector.broadcast %44 : vector<1x128xf32> to vector<8x128xf32>
    %49 = arith.mulf %48, %47 : vector<8x128xf32>
    %50 = arith.addf %37, %49 : vector<8x128xf32>
    %c2_26 = arith.constant 2 : index
    %c0_27 = arith.constant 0 : index
    %c0_28 = arith.constant 0 : index
    %51 = vector.load %arg1[%c2_26, %c0_27, %c0_28] : memref<16x16x128xbf16, #tpu.memory_space<vmem>>, vector<1x16x128xbf16>
    %52 = vector.shape_cast %51 : vector<1x16x128xbf16> to vector<16x128xbf16>
    %53 = arith.extf %52 : vector<16x128xbf16> to vector<16x128xf32>
    %54 = vector.broadcast %44 : vector<1x128xf32> to vector<16x128xf32>
    %55 = arith.mulf %54, %53 : vector<16x128xf32>
    %56 = arith.addf %43, %55 : vector<16x128xf32>
    %57 = vector.extract_strided_slice %15 {offsets = [3, 0], sizes = [1, 128], strides = [1, 1]} : vector<16x128xf32> to vector<1x128xf32>
    %c3 = arith.constant 3 : index
    %c0_29 = arith.constant 0 : index
    %c0_30 = arith.constant 0 : index
    %58 = vector.load %arg4[%c3, %c0_29, %c0_30] : memref<16x8x128xbf16, #tpu.memory_space<vmem>>, vector<1x8x128xbf16>
    %59 = vector.shape_cast %58 : vector<1x8x128xbf16> to vector<8x128xbf16>
    %60 = arith.extf %59 : vector<8x128xbf16> to vector<8x128xf32>
    %61 = vector.broadcast %57 : vector<1x128xf32> to vector<8x128xf32>
    %62 = arith.mulf %61, %60 : vector<8x128xf32>
    %63 = arith.addf %50, %62 : vector<8x128xf32>
    %c3_31 = arith.constant 3 : index
    %c0_32 = arith.constant 0 : index
    %c0_33 = arith.constant 0 : index
    %64 = vector.load %arg1[%c3_31, %c0_32, %c0_33] : memref<16x16x128xbf16, #tpu.memory_space<vmem>>, vector<1x16x128xbf16>
    %65 = vector.shape_cast %64 : vector<1x16x128xbf16> to vector<16x128xbf16>
    %66 = arith.extf %65 : vector<16x128xbf16> to vector<16x128xf32>
    %67 = vector.broadcast %57 : vector<1x128xf32> to vector<16x128xf32>
    %68 = arith.mulf %67, %66 : vector<16x128xf32>
    %69 = arith.addf %56, %68 : vector<16x128xf32>
    %70 = vector.extract_strided_slice %15 {offsets = [4, 0], sizes = [1, 128], strides = [1, 1]} : vector<16x128xf32> to vector<1x128xf32>
    %c4 = arith.constant 4 : index
    %c0_34 = arith.constant 0 : index
    %c0_35 = arith.constant 0 : index
    %71 = vector.load %arg4[%c4, %c0_34, %c0_35] : memref<16x8x128xbf16, #tpu.memory_space<vmem>>, vector<1x8x128xbf16>
    %72 = vector.shape_cast %71 : vector<1x8x128xbf16> to vector<8x128xbf16>
    %73 = arith.extf %72 : vector<8x128xbf16> to vector<8x128xf32>
    %74 = vector.broadcast %70 : vector<1x128xf32> to vector<8x128xf32>
    %75 = arith.mulf %74, %73 : vector<8x128xf32>
    %76 = arith.addf %63, %75 : vector<8x128xf32>
    %c4_36 = arith.constant 4 : index
    %c0_37 = arith.constant 0 : index
    %c0_38 = arith.constant 0 : index
    %77 = vector.load %arg1[%c4_36, %c0_37, %c0_38] : memref<16x16x128xbf16, #tpu.memory_space<vmem>>, vector<1x16x128xbf16>
    %78 = vector.shape_cast %77 : vector<1x16x128xbf16> to vector<16x128xbf16>
    %79 = arith.extf %78 : vector<16x128xbf16> to vector<16x128xf32>
    %80 = vector.broadcast %70 : vector<1x128xf32> to vector<16x128xf32>
    %81 = arith.mulf %80, %79 : vector<16x128xf32>
    %82 = arith.addf %69, %81 : vector<16x128xf32>
    %83 = vector.extract_strided_slice %15 {offsets = [5, 0], sizes = [1, 128], strides = [1, 1]} : vector<16x128xf32> to vector<1x128xf32>
    %c5 = arith.constant 5 : index
    %c0_39 = arith.constant 0 : index
    %c0_40 = arith.constant 0 : index
    %84 = vector.load %arg4[%c5, %c0_39, %c0_40] : memref<16x8x128xbf16, #tpu.memory_space<vmem>>, vector<1x8x128xbf16>
    %85 = vector.shape_cast %84 : vector<1x8x128xbf16> to vector<8x128xbf16>
    %86 = arith.extf %85 : vector<8x128xbf16> to vector<8x128xf32>
    %87 = vector.broadcast %83 : vector<1x128xf32> to vector<8x128xf32>
    %88 = arith.mulf %87, %86 : vector<8x128xf32>
    %89 = arith.addf %76, %88 : vector<8x128xf32>
    %c5_41 = arith.constant 5 : index
    %c0_42 = arith.constant 0 : index
    %c0_43 = arith.constant 0 : index
    %90 = vector.load %arg1[%c5_41, %c0_42, %c0_43] : memref<16x16x128xbf16, #tpu.memory_space<vmem>>, vector<1x16x128xbf16>
    %91 = vector.shape_cast %90 : vector<1x16x128xbf16> to vector<16x128xbf16>
    %92 = arith.extf %91 : vector<16x128xbf16> to vector<16x128xf32>
    %93 = vector.broadcast %83 : vector<1x128xf32> to vector<16x128xf32>
    %94 = arith.mulf %93, %92 : vector<16x128xf32>
    %95 = arith.addf %82, %94 : vector<16x128xf32>
    %96 = vector.extract_strided_slice %15 {offsets = [6, 0], sizes = [1, 128], strides = [1, 1]} : vector<16x128xf32> to vector<1x128xf32>
    %c6 = arith.constant 6 : index
    %c0_44 = arith.constant 0 : index
    %c0_45 = arith.constant 0 : index
    %97 = vector.load %arg4[%c6, %c0_44, %c0_45] : memref<16x8x128xbf16, #tpu.memory_space<vmem>>, vector<1x8x128xbf16>
    %98 = vector.shape_cast %97 : vector<1x8x128xbf16> to vector<8x128xbf16>
    %99 = arith.extf %98 : vector<8x128xbf16> to vector<8x128xf32>
    %100 = vector.broadcast %96 : vector<1x128xf32> to vector<8x128xf32>
    %101 = arith.mulf %100, %99 : vector<8x128xf32>
    %102 = arith.addf %89, %101 : vector<8x128xf32>
    %c6_46 = arith.constant 6 : index
    %c0_47 = arith.constant 0 : index
    %c0_48 = arith.constant 0 : index
    %103 = vector.load %arg1[%c6_46, %c0_47, %c0_48] : memref<16x16x128xbf16, #tpu.memory_space<vmem>>, vector<1x16x128xbf16>
    %104 = vector.shape_cast %103 : vector<1x16x128xbf16> to vector<16x128xbf16>
    %105 = arith.extf %104 : vector<16x128xbf16> to vector<16x128xf32>
    %106 = vector.broadcast %96 : vector<1x128xf32> to vector<16x128xf32>
    %107 = arith.mulf %106, %105 : vector<16x128xf32>
    %108 = arith.addf %95, %107 : vector<16x128xf32>
    %109 = vector.extract_strided_slice %15 {offsets = [7, 0], sizes = [1, 128], strides = [1, 1]} : vector<16x128xf32> to vector<1x128xf32>
    %c7 = arith.constant 7 : index
    %c0_49 = arith.constant 0 : index
    %c0_50 = arith.constant 0 : index
    %110 = vector.load %arg4[%c7, %c0_49, %c0_50] : memref<16x8x128xbf16, #tpu.memory_space<vmem>>, vector<1x8x128xbf16>
    %111 = vector.shape_cast %110 : vector<1x8x128xbf16> to vector<8x128xbf16>
    %112 = arith.extf %111 : vector<8x128xbf16> to vector<8x128xf32>
    %113 = vector.broadcast %109 : vector<1x128xf32> to vector<8x128xf32>
    %114 = arith.mulf %113, %112 : vector<8x128xf32>
    %115 = arith.addf %102, %114 : vector<8x128xf32>
    %c7_51 = arith.constant 7 : index
    %c0_52 = arith.constant 0 : index
    %c0_53 = arith.constant 0 : index
    %116 = vector.load %arg1[%c7_51, %c0_52, %c0_53] : memref<16x16x128xbf16, #tpu.memory_space<vmem>>, vector<1x16x128xbf16>
    %117 = vector.shape_cast %116 : vector<1x16x128xbf16> to vector<16x128xbf16>
    %118 = arith.extf %117 : vector<16x128xbf16> to vector<16x128xf32>
    %119 = vector.broadcast %109 : vector<1x128xf32> to vector<16x128xf32>
    %120 = arith.mulf %119, %118 : vector<16x128xf32>
    %121 = arith.addf %108, %120 : vector<16x128xf32>
    %122 = vector.extract_strided_slice %15 {offsets = [8, 0], sizes = [1, 128], strides = [1, 1]} : vector<16x128xf32> to vector<1x128xf32>
    %c8 = arith.constant 8 : index
    %c0_54 = arith.constant 0 : index
    %c0_55 = arith.constant 0 : index
    %123 = vector.load %arg4[%c8, %c0_54, %c0_55] : memref<16x8x128xbf16, #tpu.memory_space<vmem>>, vector<1x8x128xbf16>
    %124 = vector.shape_cast %123 : vector<1x8x128xbf16> to vector<8x128xbf16>
    %125 = arith.extf %124 : vector<8x128xbf16> to vector<8x128xf32>
    %126 = vector.broadcast %122 : vector<1x128xf32> to vector<8x128xf32>
    %127 = arith.mulf %126, %125 : vector<8x128xf32>
    %128 = arith.addf %115, %127 : vector<8x128xf32>
    %c8_56 = arith.constant 8 : index
    %c0_57 = arith.constant 0 : index
    %c0_58 = arith.constant 0 : index
    %129 = vector.load %arg1[%c8_56, %c0_57, %c0_58] : memref<16x16x128xbf16, #tpu.memory_space<vmem>>, vector<1x16x128xbf16>
    %130 = vector.shape_cast %129 : vector<1x16x128xbf16> to vector<16x128xbf16>
    %131 = arith.extf %130 : vector<16x128xbf16> to vector<16x128xf32>
    %132 = vector.broadcast %122 : vector<1x128xf32> to vector<16x128xf32>
    %133 = arith.mulf %132, %131 : vector<16x128xf32>
    %134 = arith.addf %121, %133 : vector<16x128xf32>
    %135 = vector.extract_strided_slice %15 {offsets = [9, 0], sizes = [1, 128], strides = [1, 1]} : vector<16x128xf32> to vector<1x128xf32>
    %c9 = arith.constant 9 : index
    %c0_59 = arith.constant 0 : index
    %c0_60 = arith.constant 0 : index
    %136 = vector.load %arg4[%c9, %c0_59, %c0_60] : memref<16x8x128xbf16, #tpu.memory_space<vmem>>, vector<1x8x128xbf16>
    %137 = vector.shape_cast %136 : vector<1x8x128xbf16> to vector<8x128xbf16>
    %138 = arith.extf %137 : vector<8x128xbf16> to vector<8x128xf32>
    %139 = vector.broadcast %135 : vector<1x128xf32> to vector<8x128xf32>
    %140 = arith.mulf %139, %138 : vector<8x128xf32>
    %141 = arith.addf %128, %140 : vector<8x128xf32>
    %c9_61 = arith.constant 9 : index
    %c0_62 = arith.constant 0 : index
    %c0_63 = arith.constant 0 : index
    %142 = vector.load %arg1[%c9_61, %c0_62, %c0_63] : memref<16x16x128xbf16, #tpu.memory_space<vmem>>, vector<1x16x128xbf16>
    %143 = vector.shape_cast %142 : vector<1x16x128xbf16> to vector<16x128xbf16>
    %144 = arith.extf %143 : vector<16x128xbf16> to vector<16x128xf32>
    %145 = vector.broadcast %135 : vector<1x128xf32> to vector<16x128xf32>
    %146 = arith.mulf %145, %144 : vector<16x128xf32>
    %147 = arith.addf %134, %146 : vector<16x128xf32>
    %148 = vector.extract_strided_slice %15 {offsets = [10, 0], sizes = [1, 128], strides = [1, 1]} : vector<16x128xf32> to vector<1x128xf32>
    %c10 = arith.constant 10 : index
    %c0_64 = arith.constant 0 : index
    %c0_65 = arith.constant 0 : index
    %149 = vector.load %arg4[%c10, %c0_64, %c0_65] : memref<16x8x128xbf16, #tpu.memory_space<vmem>>, vector<1x8x128xbf16>
    %150 = vector.shape_cast %149 : vector<1x8x128xbf16> to vector<8x128xbf16>
    %151 = arith.extf %150 : vector<8x128xbf16> to vector<8x128xf32>
    %152 = vector.broadcast %148 : vector<1x128xf32> to vector<8x128xf32>
    %153 = arith.mulf %152, %151 : vector<8x128xf32>
    %154 = arith.addf %141, %153 : vector<8x128xf32>
    %c10_66 = arith.constant 10 : index
    %c0_67 = arith.constant 0 : index
    %c0_68 = arith.constant 0 : index
    %155 = vector.load %arg1[%c10_66, %c0_67, %c0_68] : memref<16x16x128xbf16, #tpu.memory_space<vmem>>, vector<1x16x128xbf16>
    %156 = vector.shape_cast %155 : vector<1x16x128xbf16> to vector<16x128xbf16>
    %157 = arith.extf %156 : vector<16x128xbf16> to vector<16x128xf32>
    %158 = vector.broadcast %148 : vector<1x128xf32> to vector<16x128xf32>
    %159 = arith.mulf %158, %157 : vector<16x128xf32>
    %160 = arith.addf %147, %159 : vector<16x128xf32>
    %161 = vector.extract_strided_slice %15 {offsets = [11, 0], sizes = [1, 128], strides = [1, 1]} : vector<16x128xf32> to vector<1x128xf32>
    %c11 = arith.constant 11 : index
    %c0_69 = arith.constant 0 : index
    %c0_70 = arith.constant 0 : index
    %162 = vector.load %arg4[%c11, %c0_69, %c0_70] : memref<16x8x128xbf16, #tpu.memory_space<vmem>>, vector<1x8x128xbf16>
    %163 = vector.shape_cast %162 : vector<1x8x128xbf16> to vector<8x128xbf16>
    %164 = arith.extf %163 : vector<8x128xbf16> to vector<8x128xf32>
    %165 = vector.broadcast %161 : vector<1x128xf32> to vector<8x128xf32>
    %166 = arith.mulf %165, %164 : vector<8x128xf32>
    %167 = arith.addf %154, %166 : vector<8x128xf32>
    %c11_71 = arith.constant 11 : index
    %c0_72 = arith.constant 0 : index
    %c0_73 = arith.constant 0 : index
    %168 = vector.load %arg1[%c11_71, %c0_72, %c0_73] : memref<16x16x128xbf16, #tpu.memory_space<vmem>>, vector<1x16x128xbf16>
    %169 = vector.shape_cast %168 : vector<1x16x128xbf16> to vector<16x128xbf16>
    %170 = arith.extf %169 : vector<16x128xbf16> to vector<16x128xf32>
    %171 = vector.broadcast %161 : vector<1x128xf32> to vector<16x128xf32>
    %172 = arith.mulf %171, %170 : vector<16x128xf32>
    %173 = arith.addf %160, %172 : vector<16x128xf32>
    %174 = vector.extract_strided_slice %15 {offsets = [12, 0], sizes = [1, 128], strides = [1, 1]} : vector<16x128xf32> to vector<1x128xf32>
    %c12 = arith.constant 12 : index
    %c0_74 = arith.constant 0 : index
    %c0_75 = arith.constant 0 : index
    %175 = vector.load %arg4[%c12, %c0_74, %c0_75] : memref<16x8x128xbf16, #tpu.memory_space<vmem>>, vector<1x8x128xbf16>
    %176 = vector.shape_cast %175 : vector<1x8x128xbf16> to vector<8x128xbf16>
    %177 = arith.extf %176 : vector<8x128xbf16> to vector<8x128xf32>
    %178 = vector.broadcast %174 : vector<1x128xf32> to vector<8x128xf32>
    %179 = arith.mulf %178, %177 : vector<8x128xf32>
    %180 = arith.addf %167, %179 : vector<8x128xf32>
    %c12_76 = arith.constant 12 : index
    %c0_77 = arith.constant 0 : index
    %c0_78 = arith.constant 0 : index
    %181 = vector.load %arg1[%c12_76, %c0_77, %c0_78] : memref<16x16x128xbf16, #tpu.memory_space<vmem>>, vector<1x16x128xbf16>
    %182 = vector.shape_cast %181 : vector<1x16x128xbf16> to vector<16x128xbf16>
    %183 = arith.extf %182 : vector<16x128xbf16> to vector<16x128xf32>
    %184 = vector.broadcast %174 : vector<1x128xf32> to vector<16x128xf32>
    %185 = arith.mulf %184, %183 : vector<16x128xf32>
    %186 = arith.addf %173, %185 : vector<16x128xf32>
    %187 = vector.extract_strided_slice %15 {offsets = [13, 0], sizes = [1, 128], strides = [1, 1]} : vector<16x128xf32> to vector<1x128xf32>
    %c13 = arith.constant 13 : index
    %c0_79 = arith.constant 0 : index
    %c0_80 = arith.constant 0 : index
    %188 = vector.load %arg4[%c13, %c0_79, %c0_80] : memref<16x8x128xbf16, #tpu.memory_space<vmem>>, vector<1x8x128xbf16>
    %189 = vector.shape_cast %188 : vector<1x8x128xbf16> to vector<8x128xbf16>
    %190 = arith.extf %189 : vector<8x128xbf16> to vector<8x128xf32>
    %191 = vector.broadcast %187 : vector<1x128xf32> to vector<8x128xf32>
    %192 = arith.mulf %191, %190 : vector<8x128xf32>
    %193 = arith.addf %180, %192 : vector<8x128xf32>
    %c13_81 = arith.constant 13 : index
    %c0_82 = arith.constant 0 : index
    %c0_83 = arith.constant 0 : index
    %194 = vector.load %arg1[%c13_81, %c0_82, %c0_83] : memref<16x16x128xbf16, #tpu.memory_space<vmem>>, vector<1x16x128xbf16>
    %195 = vector.shape_cast %194 : vector<1x16x128xbf16> to vector<16x128xbf16>
    %196 = arith.extf %195 : vector<16x128xbf16> to vector<16x128xf32>
    %197 = vector.broadcast %187 : vector<1x128xf32> to vector<16x128xf32>
    %198 = arith.mulf %197, %196 : vector<16x128xf32>
    %199 = arith.addf %186, %198 : vector<16x128xf32>
    %200 = vector.extract_strided_slice %15 {offsets = [14, 0], sizes = [1, 128], strides = [1, 1]} : vector<16x128xf32> to vector<1x128xf32>
    %c14 = arith.constant 14 : index
    %c0_84 = arith.constant 0 : index
    %c0_85 = arith.constant 0 : index
    %201 = vector.load %arg4[%c14, %c0_84, %c0_85] : memref<16x8x128xbf16, #tpu.memory_space<vmem>>, vector<1x8x128xbf16>
    %202 = vector.shape_cast %201 : vector<1x8x128xbf16> to vector<8x128xbf16>
    %203 = arith.extf %202 : vector<8x128xbf16> to vector<8x128xf32>
    %204 = vector.broadcast %200 : vector<1x128xf32> to vector<8x128xf32>
    %205 = arith.mulf %204, %203 : vector<8x128xf32>
    %206 = arith.addf %193, %205 : vector<8x128xf32>
    %c14_86 = arith.constant 14 : index
    %c0_87 = arith.constant 0 : index
    %c0_88 = arith.constant 0 : index
    %207 = vector.load %arg1[%c14_86, %c0_87, %c0_88] : memref<16x16x128xbf16, #tpu.memory_space<vmem>>, vector<1x16x128xbf16>
    %208 = vector.shape_cast %207 : vector<1x16x128xbf16> to vector<16x128xbf16>
    %209 = arith.extf %208 : vector<16x128xbf16> to vector<16x128xf32>
    %210 = vector.broadcast %200 : vector<1x128xf32> to vector<16x128xf32>
    %211 = arith.mulf %210, %209 : vector<16x128xf32>
    %212 = arith.addf %199, %211 : vector<16x128xf32>
    %213 = vector.extract_strided_slice %15 {offsets = [15, 0], sizes = [1, 128], strides = [1, 1]} : vector<16x128xf32> to vector<1x128xf32>
    %c15 = arith.constant 15 : index
    %c0_89 = arith.constant 0 : index
    %c0_90 = arith.constant 0 : index
    %214 = vector.load %arg4[%c15, %c0_89, %c0_90] : memref<16x8x128xbf16, #tpu.memory_space<vmem>>, vector<1x8x128xbf16>
    %215 = vector.shape_cast %214 : vector<1x8x128xbf16> to vector<8x128xbf16>
    %216 = arith.extf %215 : vector<8x128xbf16> to vector<8x128xf32>
    %217 = vector.broadcast %213 : vector<1x128xf32> to vector<8x128xf32>
    %218 = arith.mulf %217, %216 : vector<8x128xf32>
    %219 = arith.addf %206, %218 : vector<8x128xf32>
    %c15_91 = arith.constant 15 : index
    %c0_92 = arith.constant 0 : index
    %c0_93 = arith.constant 0 : index
    %220 = vector.load %arg1[%c15_91, %c0_92, %c0_93] : memref<16x16x128xbf16, #tpu.memory_space<vmem>>, vector<1x16x128xbf16>
    %221 = vector.shape_cast %220 : vector<1x16x128xbf16> to vector<16x128xbf16>
    %222 = arith.extf %221 : vector<16x128xbf16> to vector<16x128xf32>
    %223 = vector.broadcast %213 : vector<1x128xf32> to vector<16x128xf32>
    %224 = arith.mulf %223, %222 : vector<16x128xf32>
    %225 = arith.addf %212, %224 : vector<16x128xf32>
    %226 = arith.subf %1, %219 : vector<8x128xf32>
    %227 = arith.mulf %226, %226 : vector<8x128xf32>
    %cst_94 = arith.constant dense<0.000000e+00> : vector<128xf32>
    %228 = vector.multi_reduction <add>, %227, %cst_94 [0] : vector<8x128xf32> to vector<128xf32>
    %229 = vector.shape_cast %228 : vector<128xf32> to vector<1x128xf32>
    %c0_95 = arith.constant 0 : index
    %c0_96 = arith.constant 0 : index
    %c0_97 = arith.constant 0 : index
    %230 = vector.load %arg8[%c0_95, %c0_96, %c0_97] : memref<1x3x128xf32, #tpu.memory_space<vmem>>, vector<1x1x128xf32>
    %231 = vector.shape_cast %230 : vector<1x1x128xf32> to vector<1x128xf32>
    %232 = vector.shape_cast %229 : vector<1x128xf32> to vector<1x1x128xf32>
    tpu.vector_store %arg8[%c0_95, %c0_96, %c0_97], %232 {strides = array<i32>} : memref<1x3x128xf32, #tpu.memory_space<vmem>>, vector<1x1x128xf32>,
    %c0_98 = arith.constant 0 : index
    %c3_99 = arith.constant 3 : index
    %233 = vector.load %arg6[%c0_98, %c3_99] : memref<16x9xf32, #tpu.memory_space<vmem>>, vector<16x1xf32>
    %c0_100 = arith.constant 0 : index
    %c4_101 = arith.constant 4 : index
    %234 = vector.load %arg6[%c0_100, %c4_101] : memref<16x9xf32, #tpu.memory_space<vmem>>, vector<16x1xf32>
    %c0_102 = arith.constant 0 : index
    %c5_103 = arith.constant 5 : index
    %235 = vector.load %arg6[%c0_102, %c5_103] : memref<16x9xf32, #tpu.memory_space<vmem>>, vector<16x1xf32>
    %236 = arith.subf %225, %0 : vector<16x128xf32>
    %237 = vector.broadcast %233 : vector<16x1xf32> to vector<16x128xf32>
    %238 = arith.mulf %236, %237 : vector<16x128xf32>
    %239 = vector.broadcast %234 : vector<16x1xf32> to vector<16x128xf32>
    %240 = arith.mulf %15, %239 : vector<16x128xf32>
    %241 = arith.addf %238, %240 : vector<16x128xf32>
    %242 = vector.broadcast %235 : vector<16x1xf32> to vector<16x128xf32>
    %243 = arith.addf %241, %242 : vector<16x128xf32>
    %244 = arith.mulf %243, %2 : vector<16x128xf32>
    %cst_104 = arith.constant -1.000000e+00 : f32
    %cst_105 = arith.constant 1.000000e+00 : f32
    %245 = vector.broadcast %cst_104 : f32 to vector<16x128xf32>
    %246 = arith.maximumf %245, %244 : vector<16x128xf32>
    %247 = vector.broadcast %cst_105 : f32 to vector<16x128xf32>
    %248 = arith.minimumf %247, %246 : vector<16x128xf32>
    %cst_106 = arith.constant 0.000000e+00 : f32
    %249 = vector.broadcast %cst_106 : f32 to vector<8x128xf32>
    %cst_107 = arith.constant 0.000000e+00 : f32
    %250 = vector.broadcast %cst_107 : f32 to vector<16x128xf32>
    %251 = vector.extract_strided_slice %248 {offsets = [0, 0], sizes = [1, 128], strides = [1, 1]} : vector<16x128xf32> to vector<1x128xf32>
    %c0_108 = arith.constant 0 : index
    %c0_109 = arith.constant 0 : index
    %c0_110 = arith.constant 0 : index
    %252 = vector.load %arg4[%c0_108, %c0_109, %c0_110] : memref<16x8x128xbf16, #tpu.memory_space<vmem>>, vector<1x8x128xbf16>
    %253 = vector.shape_cast %252 : vector<1x8x128xbf16> to vector<8x128xbf16>
    %254 = arith.extf %253 : vector<8x128xbf16> to vector<8x128xf32>
    %255 = vector.broadcast %251 : vector<1x128xf32> to vector<8x128xf32>
    %256 = arith.mulf %255, %254 : vector<8x128xf32>
    %257 = arith.addf %249, %256 : vector<8x128xf32>
    %c0_111 = arith.constant 0 : index
    %c0_112 = arith.constant 0 : index
    %c0_113 = arith.constant 0 : index
    %258 = vector.load %arg1[%c0_111, %c0_112, %c0_113] : memref<16x16x128xbf16, #tpu.memory_space<vmem>>, vector<1x16x128xbf16>
    %259 = vector.shape_cast %258 : vector<1x16x128xbf16> to vector<16x128xbf16>
    %260 = arith.extf %259 : vector<16x128xbf16> to vector<16x128xf32>
    %261 = vector.broadcast %251 : vector<1x128xf32> to vector<16x128xf32>
    %262 = arith.mulf %261, %260 : vector<16x128xf32>
    %263 = arith.addf %250, %262 : vector<16x128xf32>
    %264 = vector.extract_strided_slice %248 {offsets = [1, 0], sizes = [1, 128], strides = [1, 1]} : vector<16x128xf32> to vector<1x128xf32>
    %c1_114 = arith.constant 1 : index
    %c0_115 = arith.constant 0 : index
    %c0_116 = arith.constant 0 : index
    %265 = vector.load %arg4[%c1_114, %c0_115, %c0_116] : memref<16x8x128xbf16, #tpu.memory_space<vmem>>, vector<1x8x128xbf16>
    %266 = vector.shape_cast %265 : vector<1x8x128xbf16> to vector<8x128xbf16>
    %267 = arith.extf %266 : vector<8x128xbf16> to vector<8x128xf32>
    %268 = vector.broadcast %264 : vector<1x128xf32> to vector<8x128xf32>
    %269 = arith.mulf %268, %267 : vector<8x128xf32>
    %270 = arith.addf %257, %269 : vector<8x128xf32>
    %c1_117 = arith.constant 1 : index
    %c0_118 = arith.constant 0 : index
    %c0_119 = arith.constant 0 : index
    %271 = vector.load %arg1[%c1_117, %c0_118, %c0_119] : memref<16x16x128xbf16, #tpu.memory_space<vmem>>, vector<1x16x128xbf16>
    %272 = vector.shape_cast %271 : vector<1x16x128xbf16> to vector<16x128xbf16>
    %273 = arith.extf %272 : vector<16x128xbf16> to vector<16x128xf32>
    %274 = vector.broadcast %264 : vector<1x128xf32> to vector<16x128xf32>
    %275 = arith.mulf %274, %273 : vector<16x128xf32>
    %276 = arith.addf %263, %275 : vector<16x128xf32>
    %277 = vector.extract_strided_slice %248 {offsets = [2, 0], sizes = [1, 128], strides = [1, 1]} : vector<16x128xf32> to vector<1x128xf32>
    %c2_120 = arith.constant 2 : index
    %c0_121 = arith.constant 0 : index
    %c0_122 = arith.constant 0 : index
    %278 = vector.load %arg4[%c2_120, %c0_121, %c0_122] : memref<16x8x128xbf16, #tpu.memory_space<vmem>>, vector<1x8x128xbf16>
    %279 = vector.shape_cast %278 : vector<1x8x128xbf16> to vector<8x128xbf16>
    %280 = arith.extf %279 : vector<8x128xbf16> to vector<8x128xf32>
    %281 = vector.broadcast %277 : vector<1x128xf32> to vector<8x128xf32>
    %282 = arith.mulf %281, %280 : vector<8x128xf32>
    %283 = arith.addf %270, %282 : vector<8x128xf32>
    %c2_123 = arith.constant 2 : index
    %c0_124 = arith.constant 0 : index
    %c0_125 = arith.constant 0 : index
    %284 = vector.load %arg1[%c2_123, %c0_124, %c0_125] : memref<16x16x128xbf16, #tpu.memory_space<vmem>>, vector<1x16x128xbf16>
    %285 = vector.shape_cast %284 : vector<1x16x128xbf16> to vector<16x128xbf16>
    %286 = arith.extf %285 : vector<16x128xbf16> to vector<16x128xf32>
    %287 = vector.broadcast %277 : vector<1x128xf32> to vector<16x128xf32>
    %288 = arith.mulf %287, %286 : vector<16x128xf32>
    %289 = arith.addf %276, %288 : vector<16x128xf32>
    %290 = vector.extract_strided_slice %248 {offsets = [3, 0], sizes = [1, 128], strides = [1, 1]} : vector<16x128xf32> to vector<1x128xf32>
    %c3_126 = arith.constant 3 : index
    %c0_127 = arith.constant 0 : index
    %c0_128 = arith.constant 0 : index
    %291 = vector.load %arg4[%c3_126, %c0_127, %c0_128] : memref<16x8x128xbf16, #tpu.memory_space<vmem>>, vector<1x8x128xbf16>
    %292 = vector.shape_cast %291 : vector<1x8x128xbf16> to vector<8x128xbf16>
    %293 = arith.extf %292 : vector<8x128xbf16> to vector<8x128xf32>
    %294 = vector.broadcast %290 : vector<1x128xf32> to vector<8x128xf32>
    %295 = arith.mulf %294, %293 : vector<8x128xf32>
    %296 = arith.addf %283, %295 : vector<8x128xf32>
    %c3_129 = arith.constant 3 : index
    %c0_130 = arith.constant 0 : index
    %c0_131 = arith.constant 0 : index
    %297 = vector.load %arg1[%c3_129, %c0_130, %c0_131] : memref<16x16x128xbf16, #tpu.memory_space<vmem>>, vector<1x16x128xbf16>
    %298 = vector.shape_cast %297 : vector<1x16x128xbf16> to vector<16x128xbf16>
    %299 = arith.extf %298 : vector<16x128xbf16> to vector<16x128xf32>
    %300 = vector.broadcast %290 : vector<1x128xf32> to vector<16x128xf32>
    %301 = arith.mulf %300, %299 : vector<16x128xf32>
    %302 = arith.addf %289, %301 : vector<16x128xf32>
    %303 = vector.extract_strided_slice %248 {offsets = [4, 0], sizes = [1, 128], strides = [1, 1]} : vector<16x128xf32> to vector<1x128xf32>
    %c4_132 = arith.constant 4 : index
    %c0_133 = arith.constant 0 : index
    %c0_134 = arith.constant 0 : index
    %304 = vector.load %arg4[%c4_132, %c0_133, %c0_134] : memref<16x8x128xbf16, #tpu.memory_space<vmem>>, vector<1x8x128xbf16>
    %305 = vector.shape_cast %304 : vector<1x8x128xbf16> to vector<8x128xbf16>
    %306 = arith.extf %305 : vector<8x128xbf16> to vector<8x128xf32>
    %307 = vector.broadcast %303 : vector<1x128xf32> to vector<8x128xf32>
    %308 = arith.mulf %307, %306 : vector<8x128xf32>
    %309 = arith.addf %296, %308 : vector<8x128xf32>
    %c4_135 = arith.constant 4 : index
    %c0_136 = arith.constant 0 : index
    %c0_137 = arith.constant 0 : index
    %310 = vector.load %arg1[%c4_135, %c0_136, %c0_137] : memref<16x16x128xbf16, #tpu.memory_space<vmem>>, vector<1x16x128xbf16>
    %311 = vector.shape_cast %310 : vector<1x16x128xbf16> to vector<16x128xbf16>
    %312 = arith.extf %311 : vector<16x128xbf16> to vector<16x128xf32>
    %313 = vector.broadcast %303 : vector<1x128xf32> to vector<16x128xf32>
    %314 = arith.mulf %313, %312 : vector<16x128xf32>
    %315 = arith.addf %302, %314 : vector<16x128xf32>
    %316 = vector.extract_strided_slice %248 {offsets = [5, 0], sizes = [1, 128], strides = [1, 1]} : vector<16x128xf32> to vector<1x128xf32>
    %c5_138 = arith.constant 5 : index
    %c0_139 = arith.constant 0 : index
    %c0_140 = arith.constant 0 : index
    %317 = vector.load %arg4[%c5_138, %c0_139, %c0_140] : memref<16x8x128xbf16, #tpu.memory_space<vmem>>, vector<1x8x128xbf16>
    %318 = vector.shape_cast %317 : vector<1x8x128xbf16> to vector<8x128xbf16>
    %319 = arith.extf %318 : vector<8x128xbf16> to vector<8x128xf32>
    %320 = vector.broadcast %316 : vector<1x128xf32> to vector<8x128xf32>
    %321 = arith.mulf %320, %319 : vector<8x128xf32>
    %322 = arith.addf %309, %321 : vector<8x128xf32>
    %c5_141 = arith.constant 5 : index
    %c0_142 = arith.constant 0 : index
    %c0_143 = arith.constant 0 : index
    %323 = vector.load %arg1[%c5_141, %c0_142, %c0_143] : memref<16x16x128xbf16, #tpu.memory_space<vmem>>, vector<1x16x128xbf16>
    %324 = vector.shape_cast %323 : vector<1x16x128xbf16> to vector<16x128xbf16>
    %325 = arith.extf %324 : vector<16x128xbf16> to vector<16x128xf32>
    %326 = vector.broadcast %316 : vector<1x128xf32> to vector<16x128xf32>
    %327 = arith.mulf %326, %325 : vector<16x128xf32>
    %328 = arith.addf %315, %327 : vector<16x128xf32>
    %329 = vector.extract_strided_slice %248 {offsets = [6, 0], sizes = [1, 128], strides = [1, 1]} : vector<16x128xf32> to vector<1x128xf32>
    %c6_144 = arith.constant 6 : index
    %c0_145 = arith.constant 0 : index
    %c0_146 = arith.constant 0 : index
    %330 = vector.load %arg4[%c6_144, %c0_145, %c0_146] : memref<16x8x128xbf16, #tpu.memory_space<vmem>>, vector<1x8x128xbf16>
    %331 = vector.shape_cast %330 : vector<1x8x128xbf16> to vector<8x128xbf16>
    %332 = arith.extf %331 : vector<8x128xbf16> to vector<8x128xf32>
    %333 = vector.broadcast %329 : vector<1x128xf32> to vector<8x128xf32>
    %334 = arith.mulf %333, %332 : vector<8x128xf32>
    %335 = arith.addf %322, %334 : vector<8x128xf32>
    %c6_147 = arith.constant 6 : index
    %c0_148 = arith.constant 0 : index
    %c0_149 = arith.constant 0 : index
    %336 = vector.load %arg1[%c6_147, %c0_148, %c0_149] : memref<16x16x128xbf16, #tpu.memory_space<vmem>>, vector<1x16x128xbf16>
    %337 = vector.shape_cast %336 : vector<1x16x128xbf16> to vector<16x128xbf16>
    %338 = arith.extf %337 : vector<16x128xbf16> to vector<16x128xf32>
    %339 = vector.broadcast %329 : vector<1x128xf32> to vector<16x128xf32>
    %340 = arith.mulf %339, %338 : vector<16x128xf32>
    %341 = arith.addf %328, %340 : vector<16x128xf32>
    %342 = vector.extract_strided_slice %248 {offsets = [7, 0], sizes = [1, 128], strides = [1, 1]} : vector<16x128xf32> to vector<1x128xf32>
    %c7_150 = arith.constant 7 : index
    %c0_151 = arith.constant 0 : index
    %c0_152 = arith.constant 0 : index
    %343 = vector.load %arg4[%c7_150, %c0_151, %c0_152] : memref<16x8x128xbf16, #tpu.memory_space<vmem>>, vector<1x8x128xbf16>
    %344 = vector.shape_cast %343 : vector<1x8x128xbf16> to vector<8x128xbf16>
    %345 = arith.extf %344 : vector<8x128xbf16> to vector<8x128xf32>
    %346 = vector.broadcast %342 : vector<1x128xf32> to vector<8x128xf32>
    %347 = arith.mulf %346, %345 : vector<8x128xf32>
    %348 = arith.addf %335, %347 : vector<8x128xf32>
    %c7_153 = arith.constant 7 : index
    %c0_154 = arith.constant 0 : index
    %c0_155 = arith.constant 0 : index
    %349 = vector.load %arg1[%c7_153, %c0_154, %c0_155] : memref<16x16x128xbf16, #tpu.memory_space<vmem>>, vector<1x16x128xbf16>
    %350 = vector.shape_cast %349 : vector<1x16x128xbf16> to vector<16x128xbf16>
    %351 = arith.extf %350 : vector<16x128xbf16> to vector<16x128xf32>
    %352 = vector.broadcast %342 : vector<1x128xf32> to vector<16x128xf32>
    %353 = arith.mulf %352, %351 : vector<16x128xf32>
    %354 = arith.addf %341, %353 : vector<16x128xf32>
    %355 = vector.extract_strided_slice %248 {offsets = [8, 0], sizes = [1, 128], strides = [1, 1]} : vector<16x128xf32> to vector<1x128xf32>
    %c8_156 = arith.constant 8 : index
    %c0_157 = arith.constant 0 : index
    %c0_158 = arith.constant 0 : index
    %356 = vector.load %arg4[%c8_156, %c0_157, %c0_158] : memref<16x8x128xbf16, #tpu.memory_space<vmem>>, vector<1x8x128xbf16>
    %357 = vector.shape_cast %356 : vector<1x8x128xbf16> to vector<8x128xbf16>
    %358 = arith.extf %357 : vector<8x128xbf16> to vector<8x128xf32>
    %359 = vector.broadcast %355 : vector<1x128xf32> to vector<8x128xf32>
    %360 = arith.mulf %359, %358 : vector<8x128xf32>
    %361 = arith.addf %348, %360 : vector<8x128xf32>
    %c8_159 = arith.constant 8 : index
    %c0_160 = arith.constant 0 : index
    %c0_161 = arith.constant 0 : index
    %362 = vector.load %arg1[%c8_159, %c0_160, %c0_161] : memref<16x16x128xbf16, #tpu.memory_space<vmem>>, vector<1x16x128xbf16>
    %363 = vector.shape_cast %362 : vector<1x16x128xbf16> to vector<16x128xbf16>
    %364 = arith.extf %363 : vector<16x128xbf16> to vector<16x128xf32>
    %365 = vector.broadcast %355 : vector<1x128xf32> to vector<16x128xf32>
    %366 = arith.mulf %365, %364 : vector<16x128xf32>
    %367 = arith.addf %354, %366 : vector<16x128xf32>
    %368 = vector.extract_strided_slice %248 {offsets = [9, 0], sizes = [1, 128], strides = [1, 1]} : vector<16x128xf32> to vector<1x128xf32>
    %c9_162 = arith.constant 9 : index
    %c0_163 = arith.constant 0 : index
    %c0_164 = arith.constant 0 : index
    %369 = vector.load %arg4[%c9_162, %c0_163, %c0_164] : memref<16x8x128xbf16, #tpu.memory_space<vmem>>, vector<1x8x128xbf16>
    %370 = vector.shape_cast %369 : vector<1x8x128xbf16> to vector<8x128xbf16>
    %371 = arith.extf %370 : vector<8x128xbf16> to vector<8x128xf32>
    %372 = vector.broadcast %368 : vector<1x128xf32> to vector<8x128xf32>
    %373 = arith.mulf %372, %371 : vector<8x128xf32>
    %374 = arith.addf %361, %373 : vector<8x128xf32>
    %c9_165 = arith.constant 9 : index
    %c0_166 = arith.constant 0 : index
    %c0_167 = arith.constant 0 : index
    %375 = vector.load %arg1[%c9_165, %c0_166, %c0_167] : memref<16x16x128xbf16, #tpu.memory_space<vmem>>, vector<1x16x128xbf16>
    %376 = vector.shape_cast %375 : vector<1x16x128xbf16> to vector<16x128xbf16>
    %377 = arith.extf %376 : vector<16x128xbf16> to vector<16x128xf32>
    %378 = vector.broadcast %368 : vector<1x128xf32> to vector<16x128xf32>
    %379 = arith.mulf %378, %377 : vector<16x128xf32>
    %380 = arith.addf %367, %379 : vector<16x128xf32>
    %381 = vector.extract_strided_slice %248 {offsets = [10, 0], sizes = [1, 128], strides = [1, 1]} : vector<16x128xf32> to vector<1x128xf32>
    %c10_168 = arith.constant 10 : index
    %c0_169 = arith.constant 0 : index
    %c0_170 = arith.constant 0 : index
    %382 = vector.load %arg4[%c10_168, %c0_169, %c0_170] : memref<16x8x128xbf16, #tpu.memory_space<vmem>>, vector<1x8x128xbf16>
    %383 = vector.shape_cast %382 : vector<1x8x128xbf16> to vector<8x128xbf16>
    %384 = arith.extf %383 : vector<8x128xbf16> to vector<8x128xf32>
    %385 = vector.broadcast %381 : vector<1x128xf32> to vector<8x128xf32>
    %386 = arith.mulf %385, %384 : vector<8x128xf32>
    %387 = arith.addf %374, %386 : vector<8x128xf32>
    %c10_171 = arith.constant 10 : index
    %c0_172 = arith.constant 0 : index
    %c0_173 = arith.constant 0 : index
    %388 = vector.load %arg1[%c10_171, %c0_172, %c0_173] : memref<16x16x128xbf16, #tpu.memory_space<vmem>>, vector<1x16x128xbf16>
    %389 = vector.shape_cast %388 : vector<1x16x128xbf16> to vector<16x128xbf16>
    %390 = arith.extf %389 : vector<16x128xbf16> to vector<16x128xf32>
    %391 = vector.broadcast %381 : vector<1x128xf32> to vector<16x128xf32>
    %392 = arith.mulf %391, %390 : vector<16x128xf32>
    %393 = arith.addf %380, %392 : vector<16x128xf32>
    %394 = vector.extract_strided_slice %248 {offsets = [11, 0], sizes = [1, 128], strides = [1, 1]} : vector<16x128xf32> to vector<1x128xf32>
    %c11_174 = arith.constant 11 : index
    %c0_175 = arith.constant 0 : index
    %c0_176 = arith.constant 0 : index
    %395 = vector.load %arg4[%c11_174, %c0_175, %c0_176] : memref<16x8x128xbf16, #tpu.memory_space<vmem>>, vector<1x8x128xbf16>
    %396 = vector.shape_cast %395 : vector<1x8x128xbf16> to vector<8x128xbf16>
    %397 = arith.extf %396 : vector<8x128xbf16> to vector<8x128xf32>
    %398 = vector.broadcast %394 : vector<1x128xf32> to vector<8x128xf32>
    %399 = arith.mulf %398, %397 : vector<8x128xf32>
    %400 = arith.addf %387, %399 : vector<8x128xf32>
    %c11_177 = arith.constant 11 : index
    %c0_178 = arith.constant 0 : index
    %c0_179 = arith.constant 0 : index
    %401 = vector.load %arg1[%c11_177, %c0_178, %c0_179] : memref<16x16x128xbf16, #tpu.memory_space<vmem>>, vector<1x16x128xbf16>
    %402 = vector.shape_cast %401 : vector<1x16x128xbf16> to vector<16x128xbf16>
    %403 = arith.extf %402 : vector<16x128xbf16> to vector<16x128xf32>
    %404 = vector.broadcast %394 : vector<1x128xf32> to vector<16x128xf32>
    %405 = arith.mulf %404, %403 : vector<16x128xf32>
    %406 = arith.addf %393, %405 : vector<16x128xf32>
    %407 = vector.extract_strided_slice %248 {offsets = [12, 0], sizes = [1, 128], strides = [1, 1]} : vector<16x128xf32> to vector<1x128xf32>
    %c12_180 = arith.constant 12 : index
    %c0_181 = arith.constant 0 : index
    %c0_182 = arith.constant 0 : index
    %408 = vector.load %arg4[%c12_180, %c0_181, %c0_182] : memref<16x8x128xbf16, #tpu.memory_space<vmem>>, vector<1x8x128xbf16>
    %409 = vector.shape_cast %408 : vector<1x8x128xbf16> to vector<8x128xbf16>
    %410 = arith.extf %409 : vector<8x128xbf16> to vector<8x128xf32>
    %411 = vector.broadcast %407 : vector<1x128xf32> to vector<8x128xf32>
    %412 = arith.mulf %411, %410 : vector<8x128xf32>
    %413 = arith.addf %400, %412 : vector<8x128xf32>
    %c12_183 = arith.constant 12 : index
    %c0_184 = arith.constant 0 : index
    %c0_185 = arith.constant 0 : index
    %414 = vector.load %arg1[%c12_183, %c0_184, %c0_185] : memref<16x16x128xbf16, #tpu.memory_space<vmem>>, vector<1x16x128xbf16>
    %415 = vector.shape_cast %414 : vector<1x16x128xbf16> to vector<16x128xbf16>
    %416 = arith.extf %415 : vector<16x128xbf16> to vector<16x128xf32>
    %417 = vector.broadcast %407 : vector<1x128xf32> to vector<16x128xf32>
    %418 = arith.mulf %417, %416 : vector<16x128xf32>
    %419 = arith.addf %406, %418 : vector<16x128xf32>
    %420 = vector.extract_strided_slice %248 {offsets = [13, 0], sizes = [1, 128], strides = [1, 1]} : vector<16x128xf32> to vector<1x128xf32>
    %c13_186 = arith.constant 13 : index
    %c0_187 = arith.constant 0 : index
    %c0_188 = arith.constant 0 : index
    %421 = vector.load %arg4[%c13_186, %c0_187, %c0_188] : memref<16x8x128xbf16, #tpu.memory_space<vmem>>, vector<1x8x128xbf16>
    %422 = vector.shape_cast %421 : vector<1x8x128xbf16> to vector<8x128xbf16>
    %423 = arith.extf %422 : vector<8x128xbf16> to vector<8x128xf32>
    %424 = vector.broadcast %420 : vector<1x128xf32> to vector<8x128xf32>
    %425 = arith.mulf %424, %423 : vector<8x128xf32>
    %426 = arith.addf %413, %425 : vector<8x128xf32>
    %c13_189 = arith.constant 13 : index
    %c0_190 = arith.constant 0 : index
    %c0_191 = arith.constant 0 : index
    %427 = vector.load %arg1[%c13_189, %c0_190, %c0_191] : memref<16x16x128xbf16, #tpu.memory_space<vmem>>, vector<1x16x128xbf16>
    %428 = vector.shape_cast %427 : vector<1x16x128xbf16> to vector<16x128xbf16>
    %429 = arith.extf %428 : vector<16x128xbf16> to vector<16x128xf32>
    %430 = vector.broadcast %420 : vector<1x128xf32> to vector<16x128xf32>
    %431 = arith.mulf %430, %429 : vector<16x128xf32>
    %432 = arith.addf %419, %431 : vector<16x128xf32>
    %433 = vector.extract_strided_slice %248 {offsets = [14, 0], sizes = [1, 128], strides = [1, 1]} : vector<16x128xf32> to vector<1x128xf32>
    %c14_192 = arith.constant 14 : index
    %c0_193 = arith.constant 0 : index
    %c0_194 = arith.constant 0 : index
    %434 = vector.load %arg4[%c14_192, %c0_193, %c0_194] : memref<16x8x128xbf16, #tpu.memory_space<vmem>>, vector<1x8x128xbf16>
    %435 = vector.shape_cast %434 : vector<1x8x128xbf16> to vector<8x128xbf16>
    %436 = arith.extf %435 : vector<8x128xbf16> to vector<8x128xf32>
    %437 = vector.broadcast %433 : vector<1x128xf32> to vector<8x128xf32>
    %438 = arith.mulf %437, %436 : vector<8x128xf32>
    %439 = arith.addf %426, %438 : vector<8x128xf32>
    %c14_195 = arith.constant 14 : index
    %c0_196 = arith.constant 0 : index
    %c0_197 = arith.constant 0 : index
    %440 = vector.load %arg1[%c14_195, %c0_196, %c0_197] : memref<16x16x128xbf16, #tpu.memory_space<vmem>>, vector<1x16x128xbf16>
    %441 = vector.shape_cast %440 : vector<1x16x128xbf16> to vector<16x128xbf16>
    %442 = arith.extf %441 : vector<16x128xbf16> to vector<16x128xf32>
    %443 = vector.broadcast %433 : vector<1x128xf32> to vector<16x128xf32>
    %444 = arith.mulf %443, %442 : vector<16x128xf32>
    %445 = arith.addf %432, %444 : vector<16x128xf32>
    %446 = vector.extract_strided_slice %248 {offsets = [15, 0], sizes = [1, 128], strides = [1, 1]} : vector<16x128xf32> to vector<1x128xf32>
    %c15_198 = arith.constant 15 : index
    %c0_199 = arith.constant 0 : index
    %c0_200 = arith.constant 0 : index
    %447 = vector.load %arg4[%c15_198, %c0_199, %c0_200] : memref<16x8x128xbf16, #tpu.memory_space<vmem>>, vector<1x8x128xbf16>
    %448 = vector.shape_cast %447 : vector<1x8x128xbf16> to vector<8x128xbf16>
    %449 = arith.extf %448 : vector<8x128xbf16> to vector<8x128xf32>
    %450 = vector.broadcast %446 : vector<1x128xf32> to vector<8x128xf32>
    %451 = arith.mulf %450, %449 : vector<8x128xf32>
    %452 = arith.addf %439, %451 : vector<8x128xf32>
    %c15_201 = arith.constant 15 : index
    %c0_202 = arith.constant 0 : index
    %c0_203 = arith.constant 0 : index
    %453 = vector.load %arg1[%c15_201, %c0_202, %c0_203] : memref<16x16x128xbf16, #tpu.memory_space<vmem>>, vector<1x16x128xbf16>
    %454 = vector.shape_cast %453 : vector<1x16x128xbf16> to vector<16x128xbf16>
    %455 = arith.extf %454 : vector<16x128xbf16> to vector<16x128xf32>
    %456 = vector.broadcast %446 : vector<1x128xf32> to vector<16x128xf32>
    %457 = arith.mulf %456, %455 : vector<16x128xf32>
    %458 = arith.addf %445, %457 : vector<16x128xf32>
    %459 = arith.subf %1, %452 : vector<8x128xf32>
    %460 = arith.mulf %459, %459 : vector<8x128xf32>
    %cst_204 = arith.constant dense<0.000000e+00> : vector<128xf32>
    %461 = vector.multi_reduction <add>, %460, %cst_204 [0] : vector<8x128xf32> to vector<128xf32>
    %462 = vector.shape_cast %461 : vector<128xf32> to vector<1x128xf32>
    %c0_205 = arith.constant 0 : index
    %c1_206 = arith.constant 1 : index
    %c0_207 = arith.constant 0 : index
    %463 = vector.load %arg8[%c0_205, %c1_206, %c0_207] : memref<1x3x128xf32, #tpu.memory_space<vmem>>, vector<1x1x128xf32>
    %464 = vector.shape_cast %463 : vector<1x1x128xf32> to vector<1x128xf32>
    %465 = vector.shape_cast %462 : vector<1x128xf32> to vector<1x1x128xf32>
    tpu.vector_store %arg8[%c0_205, %c1_206, %c0_207], %465 {strides = array<i32>} : memref<1x3x128xf32, #tpu.memory_space<vmem>>, vector<1x1x128xf32>,
    %c0_208 = arith.constant 0 : index
    %c6_209 = arith.constant 6 : index
    %466 = vector.load %arg6[%c0_208, %c6_209] : memref<16x9xf32, #tpu.memory_space<vmem>>, vector<16x1xf32>
    %c0_210 = arith.constant 0 : index
    %c7_211 = arith.constant 7 : index
    %467 = vector.load %arg6[%c0_210, %c7_211] : memref<16x9xf32, #tpu.memory_space<vmem>>, vector<16x1xf32>
    %c0_212 = arith.constant 0 : index
    %c8_213 = arith.constant 8 : index
    %468 = vector.load %arg6[%c0_212, %c8_213] : memref<16x9xf32, #tpu.memory_space<vmem>>, vector<16x1xf32>
    %469 = arith.subf %458, %0 : vector<16x128xf32>
    %470 = vector.broadcast %466 : vector<16x1xf32> to vector<16x128xf32>
    %471 = arith.mulf %469, %470 : vector<16x128xf32>
    %472 = vector.broadcast %467 : vector<16x1xf32> to vector<16x128xf32>
    %473 = arith.mulf %248, %472 : vector<16x128xf32>
    %474 = arith.addf %471, %473 : vector<16x128xf32>
    %475 = vector.broadcast %468 : vector<16x1xf32> to vector<16x128xf32>
    %476 = arith.addf %474, %475 : vector<16x128xf32>
    %477 = arith.mulf %476, %2 : vector<16x128xf32>
    %cst_214 = arith.constant -1.000000e+00 : f32
    %cst_215 = arith.constant 1.000000e+00 : f32
    %478 = vector.broadcast %cst_214 : f32 to vector<16x128xf32>
    %479 = arith.maximumf %478, %477 : vector<16x128xf32>
    %480 = vector.broadcast %cst_215 : f32 to vector<16x128xf32>
    %481 = arith.minimumf %480, %479 : vector<16x128xf32>
    %cst_216 = arith.constant 0.000000e+00 : f32
    %482 = vector.broadcast %cst_216 : f32 to vector<8x128xf32>
    %483 = vector.extract_strided_slice %481 {offsets = [0, 0], sizes = [1, 128], strides = [1, 1]} : vector<16x128xf32> to vector<1x128xf32>
    %c0_217 = arith.constant 0 : index
    %c0_218 = arith.constant 0 : index
    %c0_219 = arith.constant 0 : index
    %484 = vector.load %arg4[%c0_217, %c0_218, %c0_219] : memref<16x8x128xbf16, #tpu.memory_space<vmem>>, vector<1x8x128xbf16>
    %485 = vector.shape_cast %484 : vector<1x8x128xbf16> to vector<8x128xbf16>
    %486 = arith.extf %485 : vector<8x128xbf16> to vector<8x128xf32>
    %487 = vector.broadcast %483 : vector<1x128xf32> to vector<8x128xf32>
    %488 = arith.mulf %487, %486 : vector<8x128xf32>
    %489 = arith.addf %482, %488 : vector<8x128xf32>
    %490 = vector.extract_strided_slice %481 {offsets = [1, 0], sizes = [1, 128], strides = [1, 1]} : vector<16x128xf32> to vector<1x128xf32>
    %c1_220 = arith.constant 1 : index
    %c0_221 = arith.constant 0 : index
    %c0_222 = arith.constant 0 : index
    %491 = vector.load %arg4[%c1_220, %c0_221, %c0_222] : memref<16x8x128xbf16, #tpu.memory_space<vmem>>, vector<1x8x128xbf16>
    %492 = vector.shape_cast %491 : vector<1x8x128xbf16> to vector<8x128xbf16>
    %493 = arith.extf %492 : vector<8x128xbf16> to vector<8x128xf32>
    %494 = vector.broadcast %490 : vector<1x128xf32> to vector<8x128xf32>
    %495 = arith.mulf %494, %493 : vector<8x128xf32>
    %496 = arith.addf %489, %495 : vector<8x128xf32>
    %497 = vector.extract_strided_slice %481 {offsets = [2, 0], sizes = [1, 128], strides = [1, 1]} : vector<16x128xf32> to vector<1x128xf32>
    %c2_223 = arith.constant 2 : index
    %c0_224 = arith.constant 0 : index
    %c0_225 = arith.constant 0 : index
    %498 = vector.load %arg4[%c2_223, %c0_224, %c0_225] : memref<16x8x128xbf16, #tpu.memory_space<vmem>>, vector<1x8x128xbf16>
    %499 = vector.shape_cast %498 : vector<1x8x128xbf16> to vector<8x128xbf16>
    %500 = arith.extf %499 : vector<8x128xbf16> to vector<8x128xf32>
    %501 = vector.broadcast %497 : vector<1x128xf32> to vector<8x128xf32>
    %502 = arith.mulf %501, %500 : vector<8x128xf32>
    %503 = arith.addf %496, %502 : vector<8x128xf32>
    %504 = vector.extract_strided_slice %481 {offsets = [3, 0], sizes = [1, 128], strides = [1, 1]} : vector<16x128xf32> to vector<1x128xf32>
    %c3_226 = arith.constant 3 : index
    %c0_227 = arith.constant 0 : index
    %c0_228 = arith.constant 0 : index
    %505 = vector.load %arg4[%c3_226, %c0_227, %c0_228] : memref<16x8x128xbf16, #tpu.memory_space<vmem>>, vector<1x8x128xbf16>
    %506 = vector.shape_cast %505 : vector<1x8x128xbf16> to vector<8x128xbf16>
    %507 = arith.extf %506 : vector<8x128xbf16> to vector<8x128xf32>
    %508 = vector.broadcast %504 : vector<1x128xf32> to vector<8x128xf32>
    %509 = arith.mulf %508, %507 : vector<8x128xf32>
    %510 = arith.addf %503, %509 : vector<8x128xf32>
    %511 = vector.extract_strided_slice %481 {offsets = [4, 0], sizes = [1, 128], strides = [1, 1]} : vector<16x128xf32> to vector<1x128xf32>
    %c4_229 = arith.constant 4 : index
    %c0_230 = arith.constant 0 : index
    %c0_231 = arith.constant 0 : index
    %512 = vector.load %arg4[%c4_229, %c0_230, %c0_231] : memref<16x8x128xbf16, #tpu.memory_space<vmem>>, vector<1x8x128xbf16>
    %513 = vector.shape_cast %512 : vector<1x8x128xbf16> to vector<8x128xbf16>
    %514 = arith.extf %513 : vector<8x128xbf16> to vector<8x128xf32>
    %515 = vector.broadcast %511 : vector<1x128xf32> to vector<8x128xf32>
    %516 = arith.mulf %515, %514 : vector<8x128xf32>
    %517 = arith.addf %510, %516 : vector<8x128xf32>
    %518 = vector.extract_strided_slice %481 {offsets = [5, 0], sizes = [1, 128], strides = [1, 1]} : vector<16x128xf32> to vector<1x128xf32>
    %c5_232 = arith.constant 5 : index
    %c0_233 = arith.constant 0 : index
    %c0_234 = arith.constant 0 : index
    %519 = vector.load %arg4[%c5_232, %c0_233, %c0_234] : memref<16x8x128xbf16, #tpu.memory_space<vmem>>, vector<1x8x128xbf16>
    %520 = vector.shape_cast %519 : vector<1x8x128xbf16> to vector<8x128xbf16>
    %521 = arith.extf %520 : vector<8x128xbf16> to vector<8x128xf32>
    %522 = vector.broadcast %518 : vector<1x128xf32> to vector<8x128xf32>
    %523 = arith.mulf %522, %521 : vector<8x128xf32>
    %524 = arith.addf %517, %523 : vector<8x128xf32>
    %525 = vector.extract_strided_slice %481 {offsets = [6, 0], sizes = [1, 128], strides = [1, 1]} : vector<16x128xf32> to vector<1x128xf32>
    %c6_235 = arith.constant 6 : index
    %c0_236 = arith.constant 0 : index
    %c0_237 = arith.constant 0 : index
    %526 = vector.load %arg4[%c6_235, %c0_236, %c0_237] : memref<16x8x128xbf16, #tpu.memory_space<vmem>>, vector<1x8x128xbf16>
    %527 = vector.shape_cast %526 : vector<1x8x128xbf16> to vector<8x128xbf16>
    %528 = arith.extf %527 : vector<8x128xbf16> to vector<8x128xf32>
    %529 = vector.broadcast %525 : vector<1x128xf32> to vector<8x128xf32>
    %530 = arith.mulf %529, %528 : vector<8x128xf32>
    %531 = arith.addf %524, %530 : vector<8x128xf32>
    %532 = vector.extract_strided_slice %481 {offsets = [7, 0], sizes = [1, 128], strides = [1, 1]} : vector<16x128xf32> to vector<1x128xf32>
    %c7_238 = arith.constant 7 : index
    %c0_239 = arith.constant 0 : index
    %c0_240 = arith.constant 0 : index
    %533 = vector.load %arg4[%c7_238, %c0_239, %c0_240] : memref<16x8x128xbf16, #tpu.memory_space<vmem>>, vector<1x8x128xbf16>
    %534 = vector.shape_cast %533 : vector<1x8x128xbf16> to vector<8x128xbf16>
    %535 = arith.extf %534 : vector<8x128xbf16> to vector<8x128xf32>
    %536 = vector.broadcast %532 : vector<1x128xf32> to vector<8x128xf32>
    %537 = arith.mulf %536, %535 : vector<8x128xf32>
    %538 = arith.addf %531, %537 : vector<8x128xf32>
    %539 = vector.extract_strided_slice %481 {offsets = [8, 0], sizes = [1, 128], strides = [1, 1]} : vector<16x128xf32> to vector<1x128xf32>
    %c8_241 = arith.constant 8 : index
    %c0_242 = arith.constant 0 : index
    %c0_243 = arith.constant 0 : index
    %540 = vector.load %arg4[%c8_241, %c0_242, %c0_243] : memref<16x8x128xbf16, #tpu.memory_space<vmem>>, vector<1x8x128xbf16>
    %541 = vector.shape_cast %540 : vector<1x8x128xbf16> to vector<8x128xbf16>
    %542 = arith.extf %541 : vector<8x128xbf16> to vector<8x128xf32>
    %543 = vector.broadcast %539 : vector<1x128xf32> to vector<8x128xf32>
    %544 = arith.mulf %543, %542 : vector<8x128xf32>
    %545 = arith.addf %538, %544 : vector<8x128xf32>
    %546 = vector.extract_strided_slice %481 {offsets = [9, 0], sizes = [1, 128], strides = [1, 1]} : vector<16x128xf32> to vector<1x128xf32>
    %c9_244 = arith.constant 9 : index
    %c0_245 = arith.constant 0 : index
    %c0_246 = arith.constant 0 : index
    %547 = vector.load %arg4[%c9_244, %c0_245, %c0_246] : memref<16x8x128xbf16, #tpu.memory_space<vmem>>, vector<1x8x128xbf16>
    %548 = vector.shape_cast %547 : vector<1x8x128xbf16> to vector<8x128xbf16>
    %549 = arith.extf %548 : vector<8x128xbf16> to vector<8x128xf32>
    %550 = vector.broadcast %546 : vector<1x128xf32> to vector<8x128xf32>
    %551 = arith.mulf %550, %549 : vector<8x128xf32>
    %552 = arith.addf %545, %551 : vector<8x128xf32>
    %553 = vector.extract_strided_slice %481 {offsets = [10, 0], sizes = [1, 128], strides = [1, 1]} : vector<16x128xf32> to vector<1x128xf32>
    %c10_247 = arith.constant 10 : index
    %c0_248 = arith.constant 0 : index
    %c0_249 = arith.constant 0 : index
    %554 = vector.load %arg4[%c10_247, %c0_248, %c0_249] : memref<16x8x128xbf16, #tpu.memory_space<vmem>>, vector<1x8x128xbf16>
    %555 = vector.shape_cast %554 : vector<1x8x128xbf16> to vector<8x128xbf16>
    %556 = arith.extf %555 : vector<8x128xbf16> to vector<8x128xf32>
    %557 = vector.broadcast %553 : vector<1x128xf32> to vector<8x128xf32>
    %558 = arith.mulf %557, %556 : vector<8x128xf32>
    %559 = arith.addf %552, %558 : vector<8x128xf32>
    %560 = vector.extract_strided_slice %481 {offsets = [11, 0], sizes = [1, 128], strides = [1, 1]} : vector<16x128xf32> to vector<1x128xf32>
    %c11_250 = arith.constant 11 : index
    %c0_251 = arith.constant 0 : index
    %c0_252 = arith.constant 0 : index
    %561 = vector.load %arg4[%c11_250, %c0_251, %c0_252] : memref<16x8x128xbf16, #tpu.memory_space<vmem>>, vector<1x8x128xbf16>
    %562 = vector.shape_cast %561 : vector<1x8x128xbf16> to vector<8x128xbf16>
    %563 = arith.extf %562 : vector<8x128xbf16> to vector<8x128xf32>
    %564 = vector.broadcast %560 : vector<1x128xf32> to vector<8x128xf32>
    %565 = arith.mulf %564, %563 : vector<8x128xf32>
    %566 = arith.addf %559, %565 : vector<8x128xf32>
    %567 = vector.extract_strided_slice %481 {offsets = [12, 0], sizes = [1, 128], strides = [1, 1]} : vector<16x128xf32> to vector<1x128xf32>
    %c12_253 = arith.constant 12 : index
    %c0_254 = arith.constant 0 : index
    %c0_255 = arith.constant 0 : index
    %568 = vector.load %arg4[%c12_253, %c0_254, %c0_255] : memref<16x8x128xbf16, #tpu.memory_space<vmem>>, vector<1x8x128xbf16>
    %569 = vector.shape_cast %568 : vector<1x8x128xbf16> to vector<8x128xbf16>
    %570 = arith.extf %569 : vector<8x128xbf16> to vector<8x128xf32>
    %571 = vector.broadcast %567 : vector<1x128xf32> to vector<8x128xf32>
    %572 = arith.mulf %571, %570 : vector<8x128xf32>
    %573 = arith.addf %566, %572 : vector<8x128xf32>
    %574 = vector.extract_strided_slice %481 {offsets = [13, 0], sizes = [1, 128], strides = [1, 1]} : vector<16x128xf32> to vector<1x128xf32>
    %c13_256 = arith.constant 13 : index
    %c0_257 = arith.constant 0 : index
    %c0_258 = arith.constant 0 : index
    %575 = vector.load %arg4[%c13_256, %c0_257, %c0_258] : memref<16x8x128xbf16, #tpu.memory_space<vmem>>, vector<1x8x128xbf16>
    %576 = vector.shape_cast %575 : vector<1x8x128xbf16> to vector<8x128xbf16>
    %577 = arith.extf %576 : vector<8x128xbf16> to vector<8x128xf32>
    %578 = vector.broadcast %574 : vector<1x128xf32> to vector<8x128xf32>
    %579 = arith.mulf %578, %577 : vector<8x128xf32>
    %580 = arith.addf %573, %579 : vector<8x128xf32>
    %581 = vector.extract_strided_slice %481 {offsets = [14, 0], sizes = [1, 128], strides = [1, 1]} : vector<16x128xf32> to vector<1x128xf32>
    %c14_259 = arith.constant 14 : index
    %c0_260 = arith.constant 0 : index
    %c0_261 = arith.constant 0 : index
    %582 = vector.load %arg4[%c14_259, %c0_260, %c0_261] : memref<16x8x128xbf16, #tpu.memory_space<vmem>>, vector<1x8x128xbf16>
    %583 = vector.shape_cast %582 : vector<1x8x128xbf16> to vector<8x128xbf16>
    %584 = arith.extf %583 : vector<8x128xbf16> to vector<8x128xf32>
    %585 = vector.broadcast %581 : vector<1x128xf32> to vector<8x128xf32>
    %586 = arith.mulf %585, %584 : vector<8x128xf32>
    %587 = arith.addf %580, %586 : vector<8x128xf32>
    %588 = vector.extract_strided_slice %481 {offsets = [15, 0], sizes = [1, 128], strides = [1, 1]} : vector<16x128xf32> to vector<1x128xf32>
    %c15_262 = arith.constant 15 : index
    %c0_263 = arith.constant 0 : index
    %c0_264 = arith.constant 0 : index
    %589 = vector.load %arg4[%c15_262, %c0_263, %c0_264] : memref<16x8x128xbf16, #tpu.memory_space<vmem>>, vector<1x8x128xbf16>
    %590 = vector.shape_cast %589 : vector<1x8x128xbf16> to vector<8x128xbf16>
    %591 = arith.extf %590 : vector<8x128xbf16> to vector<8x128xf32>
    %592 = vector.broadcast %588 : vector<1x128xf32> to vector<8x128xf32>
    %593 = arith.mulf %592, %591 : vector<8x128xf32>
    %594 = arith.addf %587, %593 : vector<8x128xf32>
    %595 = arith.subf %1, %594 : vector<8x128xf32>
    %596 = arith.mulf %595, %595 : vector<8x128xf32>
    %cst_265 = arith.constant dense<0.000000e+00> : vector<128xf32>
    %597 = vector.multi_reduction <add>, %596, %cst_265 [0] : vector<8x128xf32> to vector<128xf32>
    %598 = vector.shape_cast %597 : vector<128xf32> to vector<1x128xf32>
    %c0_266 = arith.constant 0 : index
    %c2_267 = arith.constant 2 : index
    %c0_268 = arith.constant 0 : index
    %599 = vector.load %arg8[%c0_266, %c2_267, %c0_268] : memref<1x3x128xf32, #tpu.memory_space<vmem>>, vector<1x1x128xf32>
    %600 = vector.shape_cast %599 : vector<1x1x128xf32> to vector<1x128xf32>
    %601 = vector.shape_cast %598 : vector<1x128xf32> to vector<1x1x128xf32>
    tpu.vector_store %arg8[%c0_266, %c2_267, %c0_268], %601 {strides = array<i32>} : memref<1x3x128xf32, #tpu.memory_space<vmem>>, vector<1x1x128xf32>,
    %c0_269 = arith.constant 0 : index
    %c0_270 = arith.constant 0 : index
    %602 = vector.load %arg7[%c0_269, %c0_270] : memref<16x128xf32, #tpu.memory_space<vmem>>, vector<16x128xf32>
    tpu.vector_store %arg7[%c0_269, %c0_270], %481 {strides = array<i32>} : memref<16x128xf32, #tpu.memory_space<vmem>>, vector<16x128xf32>,
    return
  }
  func.func @transform_0(%arg0: i32) -> (i32, i32, i32) {
    %c0_i32 = arith.constant 0 : i32
    %c0_i32_0 = arith.constant 0 : i32
    %c0_i32_1 = arith.constant 0 : i32
    return %c0_i32, %c0_i32_0, %arg0 : i32, i32, i32
  }
  func.func @transform_1(%arg0: i32) -> (i32, i32) {
    %c0_i32 = arith.constant 0 : i32
    %c0_i32_0 = arith.constant 0 : i32
    return %c0_i32, %arg0 : i32, i32
  }
  func.func @transform_2(%arg0: i32) -> (i32, i32) {
    %c0_i32 = arith.constant 0 : i32
    %c0_i32_0 = arith.constant 0 : i32
    return %c0_i32, %arg0 : i32, i32
  }
  func.func @transform_3(%arg0: i32) -> (i32, i32, i32) {
    %c0_i32 = arith.constant 0 : i32
    %c0_i32_0 = arith.constant 0 : i32
    %c0_i32_1 = arith.constant 0 : i32
    return %c0_i32, %c0_i32_0, %arg0 : i32, i32, i32
  }
  func.func @transform_4(%arg0: i32) -> (i32, i32) {
    %c0_i32 = arith.constant 0 : i32
    %c0_i32_0 = arith.constant 0 : i32
    return %c0_i32, %arg0 : i32, i32
  }
  func.func @transform_5(%arg0: i32) -> (i32, i32) {
    %c0_i32 = arith.constant 0 : i32
    %c0_i32_0 = arith.constant 0 : i32
    %c0_i32_1 = arith.constant 0 : i32
    return %c0_i32, %c0_i32_0 : i32, i32
  }
  func.func @transform_6(%arg0: i32) -> (i32, i32) {
    %c0_i32 = arith.constant 0 : i32
    %c0_i32_0 = arith.constant 0 : i32
    return %c0_i32, %arg0 : i32, i32
  }
  func.func @transform_7(%arg0: i32) -> (i32, i32, i32) {
    %c0_i32 = arith.constant 0 : i32
    %c0_i32_0 = arith.constant 0 : i32
    %c0_i32_1 = arith.constant 0 : i32
    return %arg0, %c0_i32, %c0_i32_0 : i32, i32, i32
  }
}

</mosaic_0001>

<bundles_post_ra>
// kernel: tpu_custom_call.1
= control target key start
LH: loop header
LB: loop body
LE: loop exit
PB: predicated region body
PF: predicated region fallthrough
CT: control target
= control target key end

     0   :  { %s2889_s0 = inlined_call_operand.hbm [shape: bf16[16,16,256], index: 0, kind: input, shape index: {}]   ;;  %s2890_s1 = inlined_call_operand.hbm [shape: f32[16,256], index: 1, kind: input, shape index: {}]   ;;  %s2891_s2 = inlined_call_operand.hbm [shape: f32[8,256], index: 2, kind: input, shape index: {}]   ;;  %s2892_s3 = inlined_call_operand.hbm [shape: bf16[16,8,256], index: 3, kind: input, shape index: {}]   ;;  %s2893_s4 = inlined_call_operand.hbm [shape: f32[16,256], index: 4, kind: input, shape index: {}]   ;;  %s2894_s5 = inlined_call_operand.hbm [shape: f32[16,9], index: 5, kind: input, shape index: {}]   ;;  %s2895_s6 = inlined_call_operand.hbm [shape: f32[16,256], index: 6, kind: output, shape index: {0}]   ;;  %s2896_s7 = inlined_call_operand.vmem [shape: f32[2,3,128], index: 7, kind: output, shape index: {1}]  }
   0x1   :  { %2934 = sst [smem:[#allocation27_spill]] %s2889_s0 }
   0x2   :  { %2935 = sst [smem:[#allocation28_spill]] %s2890_s1 }
   0x3   :  { %2936 = sst [smem:[#allocation29_spill]] %s2892_s3 }
   0x4   :  { %2937 = sst [smem:[#allocation30_spill]] %s2894_s5 }
   0x5   :  { %2938 = sst [smem:[#allocation31_spill]] %s2895_s6 }
   0x6   :  { %2939 = sst [smem:[#allocation32_spill]] %s2896_s7 }
   0x7   :  { %13 = vsyncpa [#allocation3], 0 }
   0x8   :  { %15 = vsyncpa [#allocation3 + $0x1], 0 }
   0x9   :  { %16 = vsyncpa [#allocation6], 0 }
   0xa   :  { %18 = vsyncpa [#allocation6 + $0x1], 0 }
   0xb   :  { %19 = vsyncpa [#allocation9], 0 }
   0xc   :  { %21 = vsyncpa [#allocation9 + $0x1], 0 }
   0xd   :  { %22 = vsyncpa [#allocation12], 0 }
   0xe   :  { %23 = vsyncpa [#allocation4], 0 }
   0xf   :  { %25 = vsyncpa [#allocation4 + $0x1], 0  ;;  %s2101_s24 = smov 0   ;;  %s2103_s25 = smov 0  }
  0x10   :  { %s2105_s26 = smov 0   ;;  %s2107_s27 = smov 0  }
  0x11 LB: > { %2940 = sst [smem:[#allocation19_spill]] %s2030_s24  ;;  %s2122_s28 = sadd.s32 1, %s2042_s27   ;;  %s2042_s27 = sphi %s2107_s27, %s2999_s27   ;;  %s2038_s26 = sphi %s2105_s26, %s3001_s26   ;;  %s2034_s25 = sphi %s2103_s25, %s3003_s25   ;;  %s2030_s24 = sphi %s2101_s24, %s3002_s24  }
  0x12   : > { %2941 = sst [smem:[#allocation20_spill]] %s2038_s26  ;;  %s38_s29 = sadd.s32 1, %s2038_s26 }
  0x13   : > { %2942 = sst [smem:[#allocation21_spill]] %s2042_s27  ;;  %s35_s30 = ssub.s32 %s2042_s27, %s2122_s28 }
  0x14   : > { %2943 = sst [smem:[#allocation22_spill]] %s2122_s28  ;;  %p45_p0 = scmp.ne.s32.totalorder %s2038_s26, %s2034_s25 }
  0x15   : > { %p36_p1 = scmp.eq.s32.totalorder %s35_s30, 0  ;;  %p46_p2 = scmp.eq.s32.totalorder %s2042_s27, 0 }
  0x16   : > { %p1718_p5 = scmp.lt.s32.totalorder %s2042_s27, 2  ;;  %s2139_s9 = sand.u32 1, %s2038_s26  }
  0x17   : > { %s2131_s8 = scalar_select %p36_p1, %s2038_s26, %s38_s29  }
  0x18   : > { %p47_p3 = por %p46_p2, %p45_p0  ;;  %s2897_s10 = sand.u32 1, %s2042_s27  }
  0x19   : > { %2944 = sst [smem:[#allocation23_spill]] %s2131_s8  ;;  %s2898_s11 = sshll.u32 %s2139_s9, 4 }
  0x1a   : > { %p2143_p6 = pnand %p1718_p5, %p47_p3  ;;  %s2148_s13 = sshll.u32 %s2042_s27, 3 }
  0x1b   : > { %s2946_s1 = sld [smem:[#allocation28_spill]]  ;;  %s291_s18 = scalar_lea.vmem [#allocation5], %s2898_s11 }
  0x1c   : > { %s298_s19 = sshll.u32 %s291_s18, 4  ;;  %s2158_s20 = scalar_lea.sflag [#allocation6], %s2897_s10  ;;  %s299_s19 = int_to_ptr.vmem [resolvable:$true] %s298_s19 }
  0x1d   : > { %p2162_p8 = pneg %p2143_p6 }
  0x21   : > { %s295_s16 = scalar_lea.hbm %s2946_s1, %s2148_s13  ;;  %s1791_s14 = scalar_lea.hbm %s2946_s1, 32 }
  0x22   : > { %s296_s17 = sshll.u32 %s295_s16, 4  ;;  %s297_s17 = int_to_ptr.hbm [resolvable:$true] %s296_s17 }
  0x23   : > { %s1784_s21 = sshra.s32 %s297_s17, 4  ;;  %s1785_s21 = int_to_ptr.hbm [resolvable:$true] %s1784_s21 }
  0x24   : > { %s1786_s22 = scalar_lea.hbm %s1785_s21, 16  ;;  %p1792_p11 = scmp.lt.s32.totalorder %s1785_s21, %s2946_s1 }
  0x25   : > { %p1787_p7 = scmp.ne.s32.totalorder %s1785_s21, %s1786_s22  ;;  %p1793_p12 = scmp.lt.s32.totalorder %s1791_s14, %s1786_s22 }
  0x27   : > { %p1789_p9 = pnand %p2162_p8, %p1787_p7  ;;  %p1794_p13 = por %p1793_p12, %p1792_p11 }
  0x29   : > { %p1790_p10 = pneg %p1789_p9 }
  0x2b   : > { %p1795_p1 = pnand %p1794_p13, %p1790_p10 }
  0x2d   : > { %1798 = shalt.err (!%p1795_p1)
}
  0x2e   : > { %s2902_s18 = smov 256   ;;  %s2905_s10 = smov 128  }
  0x2f   : > { %s2907_s11 = smov 8   ;;  %s2948_s21 = sshll.u32 %s2139_s9, 4 }
  0x30   : > { %1703 = dma.hbm_to_vmem [thread:$0]  (!%p2143_p6), %s297_s17, 256, %s299_s19, %s2158_s20, %s2902_s18, %s2905_s10, %s2907_s11  }
  0x31   : > { %s352_s22 = scalar_lea.vmem [#allocation10], %s2948_s21  ;;  %s1382_s30 = sshll.u32 %s2042_s27, 2 }
  0x32   : > { %s359_s29 = sshll.u32 %s352_s22, 4  ;;  %s1387_s14 = sshll.u32 %s2139_s9, 6  ;;  %s2183_s29 = int_to_ptr.vmem [resolvable:$true] %s359_s29 }
  0x33   : > { %s2949_s3 = sld [smem:[#allocation29_spill]]  ;;  %s331_s28 = scalar_lea.vmem [#allocation8], %s1387_s14 }
  0x34   : > { %s338_s6 = sshll.u32 %s331_s28, 4  ;;  %s2950_s7 = sand.u32 1, %s2042_s27   ;;  %s339_s6 = int_to_ptr.vmem [resolvable:$true] %s338_s6 }
  0x35   : > { %s2193_s17 = scalar_lea.sflag [#allocation9], %s2950_s7 }
  0x39   : > { %s335_s1 = scalar_lea.hbm %s2949_s3, %s1382_s30  ;;  %s1821_s15 = scalar_lea.hbm %s2949_s3, 128 }
  0x3a   : > { %s336_s8 = sshll.u32 %s335_s1, 4  ;;  %s337_s8 = int_to_ptr.hbm [resolvable:$true] %s336_s8 }
  0x3b   : > { %s1814_s19 = sshra.s32 %s337_s8, 4  ;;  %s1815_s19 = int_to_ptr.hbm [resolvable:$true] %s1814_s19 }
  0x3c   : > { %s1816_s21 = scalar_lea.hbm %s1815_s19, 64  ;;  %p1822_p7 = scmp.lt.s32.totalorder %s1815_s19, %s2949_s3 }
  0x3d   : > { %p1817_p2 = scmp.ne.s32.totalorder %s1815_s19, %s1816_s21  ;;  %p1823_p9 = scmp.lt.s32.totalorder %s1821_s15, %s1816_s21 }
  0x3f   : > { %p1819_p3 = pnand %p1817_p2, %p2162_p8  ;;  %p1824_p10 = por %p1823_p9, %p1822_p7 }
  0x41   : > { %p1820_p5 = pneg %p1819_p3 }
  0x43   : > { %p1825_p11 = pnand %p1824_p10, %p1820_p5 }
  0x45   : > { %1828 = shalt.err (!%p1825_p11)
}
  0x46   : > { %s2903_s7 = smov 64   ;;  %s2904_s28 = smov 4  }
  0x47   : > { %1709 = dma.hbm_to_vmem [thread:$0]  (!%p2143_p6), %s337_s8, 1024, %s339_s6, %s2193_s17, %s2905_s10, %s2903_s7, %s2904_s28  }
  0x48   : > { %s2210_s18 = sadd.s32 4294967295, %s2042_s27   ;;  %s1377_s14 = sadd.s32 4294967294, %s2042_s27  }
  0x49   : > { %2951 = sst [smem:[#allocation24_spill]] %s2210_s18  ;;  %p51_p12 = scmp.ne.s32.totalorder %s2034_s25, %s2030_s24 }
  0x4a   : > { %p2917_p13 = scmp.eq.s32.totalorder %s2210_s18, 0  ;;  %p200_p1 = scmp.eq.s32.totalorder %s2210_s18, 1 }
  0x4b   : > { %p206_p2 = scmp.eq.s32.totalorder %s1377_s14, 1  ;;  %p1378_p3 = scmp.ge.s32.totalorder %s2042_s27, 1 }
  0x4c   : > { %p2220_p5 = por %p2917_p13, %p51_p12  ;;  %p2227_p7 = por %p200_p1, %p45_p0 }
  0x4d   : > { %p2231_p9 = por %p206_p2, %p51_p12  ;;  %p239_p10 = scmp.lt.s32.totalorder %s2042_s27, 3 }
  0x4e   : > { %s2953_s6 = scalar_select %p2227_p7, 1, 0 }
  0x4f   : > { %s2955_s8 = scalar_select %p2231_p9, 1, 0 }
  0x50   : > { %2954 = sst [smem:[#allocation25_spill]] %s2953_s6  ;;  %p2239_p11 = pnand %p1378_p3, %p239_p10 }
  0x51   : > { %2956 = sst [smem:[#allocation26_spill]] %s2955_s8  ;;  %s2049_s1 = smov [#allocation11]  }
  0x52   : > { %s2957_s5 = sld [smem:[#allocation30_spill]]  ;;  %p1693_p0 = pneg %p2239_p11 }
  0x53   : > { %s252_s14 = sshll.u32 %s2049_s1, 4  ;;  %s1381_s7 = sshll.u32 %s2139_s9, 7  ;;  %s253_s14 = int_to_ptr.vmem [resolvable:$true] %s252_s14 }
  0x54   : > { %p1694_p12 = pnand %p1693_p0, %p2917_p13  ;;  %s2959_s0 = sld [smem:[#allocation27_spill]] }
  0x55   : > { %s270_s10 = scalar_lea.vmem [#allocation2], %s1381_s7  ;;  %s2961_s26 = smov 128  }
  0x56   : > { %s277_s11 = sshll.u32 %s270_s10, 4  ;;  %s267_s1 = scalar_lea.sflag [#allocation3], %s2139_s9  ;;  %s278_s11 = int_to_ptr.vmem [resolvable:$true] %s277_s11 }
  0x58   : > { %s250_s15 = sshll.u32 %s2957_s5, 4  ;;  %s2960_s5 = smov 8   ;;  %s251_s15 = int_to_ptr.hbm [resolvable:$true] %s250_s15 }
  0x59   : > { %1696 = dma.hbm_to_vmem [thread:$0]  (!%p1694_p12), %s251_s15, 256, %s253_s14, [#allocation12], %s2961_s26, %s2961_s26, %s2960_s5  }
  0x5a   : > { %s274_s22 = scalar_lea.hbm %s2959_s0, %s1382_s30  ;;  %s1881_s30 = scalar_lea.hbm %s2959_s0, 256 }
  0x5b   : > { %s275_s3 = sshll.u32 %s274_s22, 4  ;;  %s276_s3 = int_to_ptr.hbm [resolvable:$true] %s275_s3 }
  0x5c   : > { %s1874_s8 = sshra.s32 %s276_s3, 4  ;;  %s1875_s8 = int_to_ptr.hbm [resolvable:$true] %s1874_s8 }
  0x5d   : > { %s1876_s24 = scalar_lea.hbm %s1875_s8, 128  ;;  %p1882_p10 = scmp.lt.s32.totalorder %s1875_s8, %s2959_s0 }
  0x5e   : > { %p1877_p1 = scmp.ne.s32.totalorder %s1875_s8, %s1876_s24  ;;  %p1883_p0 = scmp.lt.s32.totalorder %s1881_s30, %s1876_s24 }
  0x60   : > { %p1879_p2 = pnand %p1877_p1, %p2162_p8  ;;  %p1884_p12 = por %p1883_p0, %p1882_p10 }
  0x62   : > { %p1880_p3 = pneg %p1879_p2 }
  0x64   : > { %p1885_p4 = pnand %p1884_p12, %p1880_p3 }
  0x66   : > { %1888 = shalt.err (!%p1885_p4)
}
  0x67   : > { %s2962_s15 = smov 4   ;;  %s2963_s14 = smov 64  }
  0x68   : > { %1700 = dma.hbm_to_vmem [thread:$0]  (!%p2143_p6), %s276_s3, 2048, %s278_s11, %s267_s1, %s2961_s26, %s2963_s14, %s2962_s15  }
  0x69   : > { %s1385_s27 = sshll.u32 %s2139_s9, 3  ;;  %s316_s28 = scalar_lea.hbm %s2891_s2, %s2148_s13 }
  0x6a   : > { %s318_s8 = sshll.u32 %s316_s28, 4  ;;  %s312_s24 = scalar_lea.vmem [#allocation7], %s1385_s27  ;;  %s319_s8 = int_to_ptr.hbm [resolvable:$true] %s318_s8 }
  0x6b   : > { %s320_s30 = sshll.u32 %s312_s24, 4  ;;  %s356_s0 = scalar_lea.hbm %s2893_s4, %s2148_s13  ;;  %s321_s30 = int_to_ptr.vmem [resolvable:$true] %s320_s30 }
  0x6c   : > { %s1904_s6 = sshra.s32 %s319_s8, 4  ;;  %s1911_s11 = scalar_lea.hbm %s2891_s2, 16  ;;  %s1905_s6 = int_to_ptr.hbm [resolvable:$true] %s1904_s6 }
  0x6d   : > { %s1906_s18 = scalar_lea.hbm %s1905_s6, 8  ;;  %p1912_p3 = scmp.lt.s32.totalorder %s1905_s6, %s2891_s2 }
  0x6e   : > { %p1907_p4 = scmp.ne.s32.totalorder %s1905_s6, %s1906_s18  ;;  %p1913_p10 = scmp.lt.s32.totalorder %s1911_s11, %s1906_s18 }
  0x70   : > { %p1909_p1 = pnand %p1907_p4, %p2162_p8  ;;  %p1914_p0 = por %p1913_p10, %p1912_p3 }
  0x72   : > { %p1910_p2 = pneg %p1909_p1 }
  0x74   : > { %p1915_p12 = pnand %p1914_p0, %p1910_p2 }
  0x76   : > { %1918 = shalt.err (!%p1915_p12)
}
  0x77   : > { %1706 = dma.hbm_to_vmem [thread:$0]  (!%p2143_p6), %s319_s8, 128, %s321_s30, %s2158_s20  }
  0x78   : > { %s357_s13 = sshll.u32 %s356_s0, 4  ;;  %s1941_s18 = scalar_lea.hbm %s2893_s4, 32  ;;  %s358_s13 = int_to_ptr.hbm [resolvable:$true] %s357_s13 }
  0x79   : > { %s1934_s14 = sshra.s32 %s358_s13, 4  ;;  %s1935_s14 = int_to_ptr.hbm [resolvable:$true] %s1934_s14 }
  0x7a   : > { %s1936_s27 = scalar_lea.hbm %s1935_s14, 16  ;;  %p1942_p2 = scmp.lt.s32.totalorder %s1935_s14, %s2893_s4 }
  0x7b   : > { %p1937_p4 = scmp.ne.s32.totalorder %s1935_s14, %s1936_s27  ;;  %p1943_p3 = scmp.lt.s32.totalorder %s1941_s18, %s1936_s27 }
  0x7d   : > { %p1939_p1 = pnand %p1937_p4, %p2162_p8  ;;  %p1944_p10 = por %p1943_p3, %p1942_p2 }
  0x7f   : > { %p1940_p13 = pneg %p1939_p1 }
  0x81   : > { %p1945_p0 = pnand %p1944_p10, %p1940_p13 }
  0x83   : > { %1948 = shalt.err (!%p1945_p0)
}
  0x84   : > { %s2964_s0 = smov 256   ;;  %371 = sbr.rel (%p2239_p11) target bundleno = 433 (0x1b1), region = 44 }
  0x85   : > { %1712 = dma.hbm_to_vmem [thread:$0]  (!%p2143_p6), %s358_s13, 256, %s2183_s29, %s2193_s17, %s2964_s0, %s2961_s26, %s2960_s5  }
  0x86   : > { %s2308_s20 = sand.u32 (!%p2239_p11), 1, %s2034_s25  }
  0x87   : > { %s1392_s23 = sshll.u32 (!%p2239_p11), %s2308_s20, 7  ;;  %s374_s8 = scalar_lea.sflag (!%p2239_p11), [#allocation3], %s2308_s20 }
  0x88   : > { %s2312_s24 = scalar_lea.vmem (!%p2239_p11), [#allocation2], %s1392_s23 }
  0x89   : > { %2009 = dma.done.wait (%p2220_p5), %s374_s8, 2048  }
  0x8a   : > { %2011 = vsyncadd (%p2220_p5), %s374_s8, 4294965248  ;;  %s2965_s12 = sld [smem:[#allocation24_spill]]  ;;  %s2320_s26 = sshll.u32 %s2308_s20, 4 }
  0x8b   : > { %s387_s17 = scalar_lea.vmem [#allocation5], %s2320_s26 }
  0x90   : > { %s383_s5 = sand.u32 1, %s2965_s12  }
  0x91   : > { %s384_s29 = scalar_lea.sflag [#allocation6], %s383_s5 }
  0x92   : > { %2013 = dma.done.wait (%p2220_p5), %s384_s29, 384  }
  0x93   : > { %2015 = vsyncadd (%p2220_p5), %s384_s29, 4294966912  ;;  %s1394_s16 = sshll.u32 %s2308_s20, 3  ;;  %s1395_s30 = sshll.u32 %s2308_s20, 6 }
  0x94   : > { %s2329_s10 = scalar_lea.vmem [#allocation7], %s1394_s16  ;;  %s404_s7 = scalar_lea.sflag [#allocation9], %s383_s5 }
  0x95   : > { %s2331_s3 = scalar_lea.vmem [#allocation8], %s1395_s30 }
  0x96   : > { %2017 = dma.done.wait (%p2220_p5), %s404_s7, 1280  }
  0x97   : > { %2019 = vsyncadd (%p2220_p5), %s404_s7, 4294966016  ;;  %s417_s9 = scalar_lea.vmem [#allocation10], %s2320_s26  ;;  %p2966_p6 = scmp.eq.s32.totalorder %s2965_s12, 0 }
  0x99   : > { %2021 = dma.done.wait (%p2966_p6), [#allocation12], 256   ;;  %p2967_p8 = pmov %p2966_p6 }
  0x9a   : > { %v2050_v0 = vmov 0   ;;  %v2051_v1 = vmov 3   ;;  %v487_v2 = vld [vmem:[#allocation11] sm:$0xff]  ;;  %v488_v3 = vld [vmem:[#allocation11 + $0x8] sm:$0xff]  ;;  %v2052_v4 = vmov 2   ;;  %v2053_v5 = vmov 4  }
  0x9b   : > { %2023 = vsyncadd (%p2967_p8), [#allocation12], 4294967040  ;;  %1770 = vset.pattern.permute.xlu0 %v2050_v0  ;;  %1772 = vset.pattern.permute.xlu1 %v2050_v0  ;;  %v2054_v6 = vmov 5   ;;  %v2055_v7 = vmov 6   ;;  %v2056_v8 = vmov 7   ;;  %v2057_v9 = vmov 8  }
  0x9c   : > { %1774 = vset.pattern.permute.xlu2 %v2051_v1  ;;  %493 = vperm.xlu0 %1770, %v487_v2   ;;  %v2344_v11 = vld [vmem:[%s387_s17] sm:$0xff]  ;;  %v2349_v14 = vld [vmem:[%s387_s17 + $0x8] sm:$0xff]  ;;  %v2358_v20 = vld [vmem:[%s417_s9] sm:$0xff]  ;;  %p478_p13 = scmp.lt.s32.totalorder %s2965_s12, 1  ;;  %s2973_s13 = sld [smem:[#allocation32_spill]] }
  0x9d   : > { %498 = vperm.xlu1 %1772, %v488_v3   ;;  %772 = vperm.xlu2 %1774, %v487_v2   ;;  %v489_v13 = vsub.f32 0.0, %v2344_v11  ;;  %v490_v15 = vsub.f32 0.0, %v2349_v14  ;;  %v519_v17 = vld [vmem:[%s2331_s3] sm:$0xff]   ;;  %v2354_v18 = vld [vmem:[%s2312_s24] sm:$0xff]   ;;  %v2361_v21 = vld [vmem:[%s2312_s24 + $0x8] sm:$0xff]   ;;  %s2827_s27 = scalar_lea.vmem [#allocation13], %s2320_s26 }
  0x9e   : > { %v2364_v22 = vld [vmem:[%s2331_s3 + $0x8] sm:$0xff]   ;;  %v2367_v24 = vld [vmem:[%s2312_s24 + $0x10] sm:$0xff]   ;;  %v2373_v26 = vld [vmem:[%s2331_s3 + $0x10] sm:$0xff]   ;;  %v520_v28 = vunpack.c.l.bf16 %v519_v17  ;;  %v2921_v29 = vunpack.c.l.bf16 %v2354_v18  ;;  %v534_v34 = vunpack.c.h.bf16 %v519_v17  ;;  %v2920_v35 = vunpack.c.l.bf16 %v2361_v21  ;;  %s479_s19 = scalar_select %p478_p13, %s2965_s12, 1 }
  0x9f   : > { %v2370_v25 = vld [vmem:[%s2312_s24 + $0x18] sm:$0xff]   ;;  %v2377_v30 = vld [vmem:[%s2312_s24 + $0x20] sm:$0xff]   ;;  %v2380_v31 = vld [vmem:[%s2312_s24 + $0x28] sm:$0xff]   ;;  %v549_v36 = vunpack.c.l.bf16 %v2364_v22  ;;  %v2918_v39 = vunpack.c.l.bf16 %v2367_v24  ;;  %v564_v40 = vunpack.c.h.bf16 %v2364_v22  ;;  %v579_v42 = vunpack.c.l.bf16 %v2373_v26  ;;  %s1512_s21 = sshll.u32 %s2965_s12, 3  ;;  %s2993_s22 = sld [smem:[#allocation31_spill]] }
  0xa0   : > { %v2386_v37 = vld [vmem:[%s2331_s3 + $0x18] sm:$0xff]   ;;  %v2389_v38 = vld [vmem:[%s2312_s24 + $0x30] sm:$0xff]   ;;  %v2919_v41 = vunpack.c.l.bf16 %v2370_v25  ;;  %v2396_v43 = vld [vmem:[%s2312_s24 + $0x38] sm:$0xff]   ;;  %v2922_v45 = vunpack.c.l.bf16 %v2377_v30  ;;  %v594_v46 = vunpack.c.h.bf16 %v2373_v26  ;;  %v2923_v47 = vunpack.c.l.bf16 %v2380_v31  ;;  %s1399_s11 = sshll.u32 %s479_s19, 2  ;;  %s1178_s0 = sshll.u32 %s2827_s27, 4  ;;  %s2847_s0 = int_to_ptr.vmem [resolvable:$true] %s1178_s0 }
  0xa1   : > { %v2404_v48 = vld [vmem:[%s2331_s3 + $0x20] sm:$0xff]   ;;  %v2407_v49 = vld [vmem:[%s2312_s24 + $0x40] sm:$0xff]   ;;  %v609_v51 = vunpack.c.l.bf16 %v2386_v37  ;;  %v1541_v52 = vunpack.c.l.bf16 %v2389_v38  ;;  %v624_v53 = vunpack.c.h.bf16 %v2386_v37  ;;  %v2414_v54 = vld [vmem:[%s417_s9 + $0x8] sm:$0xff]  ;;  %v2924_v55 = vunpack.c.l.bf16 %v2396_v43 }
  0xa2   : > { %v2418_v56 = vld [vmem:[%s2312_s24 + $0x48] sm:$0xff]   ;;  %v2421_v57 = vld [vmem:[%s2331_s3 + $0x28] sm:$0xff]   ;;  %v639_v61 = vunpack.c.l.bf16 %v2404_v48  ;;  %v1549_v62 = vunpack.c.l.bf16 %v2407_v49  ;;  %v654_v63 = vunpack.c.h.bf16 %v2404_v48  ;;  %s2661_s14 = scalar_lea.vmem %s2973_s13, %s1399_s11 }
  0xa4   : > { %1771 = vset.pattern.permute.xlu0 %v2052_v4 }
  0xa5   : > { %1773 = vset.pattern.permute.xlu1 %v2052_v4  ;;  %504 = vperm.xlu0 %1771, %v487_v2   ;;  %s1177_s28 = scalar_lea.hbm %s2993_s22, %s1512_s21  ;;  %s1984_s17 = scalar_lea.hbm %s2993_s22, 32 }
  0xa6   : > { %508 = vperm.xlu1 %1773, %v488_v3   ;;  %1775 = vset.pattern.permute.xlu2 %v2053_v5  ;;  %s1180_s23 = sshll.u32 %s1177_s28, 4  ;;  %s2849_s23 = int_to_ptr.hbm [resolvable:$true] %s1180_s23 }
  0xa7   : > { %783 = vperm.xlu2 %1775, %v487_v2   ;;  %s1978_s12 = sshra.s32 %s2849_s23, 4  ;;  %s1979_s12 = int_to_ptr.hbm [resolvable:$true] %s1978_s12 }
  0xa8   : > { %s1980_s5 = scalar_lea.hbm %s1979_s12, 16  ;;  %p1985_p4 = scmp.lt.s32.totalorder %s1979_s12, %s2993_s22 }
  0xa9   : > { %p1981_p5 = scmp.ne.s32.totalorder %s1979_s12, %s1980_s5  ;;  %p1986_p1 = scmp.lt.s32.totalorder %s1984_s17, %s1980_s5 }
  0xab   : > { %p1982_p11 = pnand %p1981_p5, %p2227_p7  ;;  %p1987_p2 = por %p1986_p1, %p1985_p4 }
  0xad   : > { %1778 = vset.pattern.permute.xlu0 %v2053_v5  ;;  %p1983_p12 = pneg %p1982_p11 }
  0xae   : > { %1776 = vset.pattern.permute.xlu1 %v2054_v6  ;;  %787 = vperm.xlu0 %1778, %v488_v3  }
  0xaf   : > { %795 = vperm.xlu1 %1776, %v487_v2   ;;  %1777 = vset.pattern.permute.xlu2 %v2051_v1  ;;  %v2439_v1 = vld [vmem:[%s2312_s24 + $0x50] sm:$0xff]   ;;  %p1988_p3 = pnand %p1987_p2, %p1983_p12 }
  0xb0   : > { %777 = vperm.xlu2 %1777, %v488_v3   ;;  %v1557_v22 = vunpack.c.l.bf16 %v2439_v1 }
  0xb6   : > { %1782 = vset.pattern.permute.xlu0 %v2055_v7 }
  0xb7   : > { %799 = vperm.xlu1 %1776, %v488_v3   ;;  %1038 = vperm.xlu0 %1782, %v488_v3  }
  0xb8   : > { %1779 = vset.pattern.permute.xlu2 %v2055_v7 }
  0xb9   : > { %1033 = vperm.xlu2 %1779, %v487_v2  }
  0xbf   : > { %1780 = vset.pattern.permute.xlu1 %v2056_v8  ;;  %1783 = vset.pattern.permute.xlu0 %v2057_v9  ;;  %v1553_v8 = vunpack.c.l.bf16 %v2418_v56 }
  0xc0   : > { %1044 = vperm.xlu1 %1780, %v487_v2  }
  0xc1   : > { %1781 = vset.pattern.permute.xlu2 %v2057_v9  ;;  %v669_v9 = vunpack.c.l.bf16 %v2421_v57 }
  0xc2   : > { %1056 = vperm.xlu2 %1781, %v487_v2   ;;  %v2442_v2 = vld [vmem:[%s2312_s24 + $0x58] sm:$0xff]  }
  0xc3   : > { %v1561_v26 = vunpack.c.l.bf16 %v2442_v2 }
  0xc8   : > { %1048 = vperm.xlu1 %1780, %v488_v3  }
  0xca   : > { %1060 = vperm.xlu2 %1781, %v488_v3  }
 0x10e   : > { %v494_v10 = vpop.permute.xlu0 %493 }
 0x10f   : > { %v499_v12 = vpop.permute.xlu1 %498  ;;  %v501_v16 = vmul.f32 %v494_v10, %v489_v13  ;;  %v2462_v13 = vld [vmem:[%s2312_s24 + $0x60] sm:$0xff]  }
 0x110   : > { %v502_v27 = vmul.f32 %v499_v12, %v490_v15  ;;  %v2459_v12 = vld [vmem:[%s2331_s3 + $0x30] sm:$0xff]  }
 0x117   : > { %v505_v19 = vpop.permute.xlu0 %504 }
 0x118   : > { %v511_v23 = vadd.f32 %v505_v19, %v501_v16  ;;  %v509_v33 = vpop.permute.xlu1 %508 }
 0x119   : > { %v512_v50 = vadd.f32 %v509_v33, %v502_v27 }
 0x11a   : > { %v513_v32 = vmul.f32 %v511_v23, %v2358_v20  ;;  %v684_v23 = vunpack.c.h.bf16 %v2421_v57 }
 0x11b   : > { %v514_v7 = vmul.f32 %v512_v50, %v2414_v54 }
 0x11c   : > { %v2398_v44 = vclamps-f32 %v513_v32, 1.0  ;;  %v2478_v32 = vld [vmem:[%s2331_s3 + $0x38] sm:$0xff]  }
 0x11e   : > { %v2424_v58 = vperm.slane %v2398_v44, 0  ;;  %v2427_v59 = vperm.slane %v2398_v44, 1  ;;  %v2430_v60 = vperm.slane %v2398_v44, 2  ;;  %v2436_v0 = vperm.slane %v2398_v44, 3 }
 0x11f   : > { %v2456_v10 = vperm.slane %v2398_v44, 4  ;;  %v2472_v27 = vperm.slane %v2398_v44, 5 }
 0x120   : > { %v522_v3 = vmul.f32 %v2424_v58, %v520_v28  ;;  %v528_v4 = vmul.f32 %v2921_v29, %v2424_v58  ;;  %v536_v5 = vmul.f32 %v2427_v59, %v534_v34  ;;  %v543_v6 = vmul.f32 %v2920_v35, %v2427_v59  ;;  %v2475_v28 = vld [vmem:[%s2312_s24 + $0x68] sm:$0xff]   ;;  %v2503_v29 = vld [vmem:[%s2312_s24 + $0x78] sm:$0xff]  }
 0x121   : > { %v551_v17 = vmul.f32 %v2430_v60, %v549_v36  ;;  %v558_v19 = vmul.f32 %v2918_v39, %v2430_v60  ;;  %v566_v36 = vmul.f32 %v2436_v0, %v564_v40  ;;  %v573_v50 = vmul.f32 %v2919_v41, %v2436_v0  ;;  %v2492_v39 = vld [vmem:[%s2312_s24 + $0x70] sm:$0xff]   ;;  %s1163_s24 = scalar_lea.sflag [#allocation4], %s2308_s20 }
 0x122   : > { %v537_v15 = vadd.f32 %v536_v5, %v522_v3  ;;  %v545_v16 = vadd.f32 %v543_v6, %v528_v4  ;;  %v2484_v3 = vclamps-f32 %v514_v7, 1.0  ;;  %v2489_v6 = vperm.slane %v2398_v44, 6 }
 0x123   : > { %v588_v40 = vmul.f32 %v2922_v45, %v2456_v10  ;;  %v714_v7 = vunpack.c.h.bf16 %v2459_v12  ;;  %v596_v35 = vmul.f32 %v2472_v27, %v594_v46  ;;  %v2925_v45 = vunpack.c.h.bf16 %v2361_v21 }
 0x124   : > { %v552_v33 = vadd.f32 %v551_v17, %v537_v15  ;;  %v560_v34 = vadd.f32 %v558_v19, %v545_v16  ;;  %v581_v17 = vmul.f32 %v2456_v10, %v579_v42  ;;  %v603_v42 = vmul.f32 %v2923_v47, %v2472_v27 }
 0x125   : > { %v2524_v47 = vperm.slane %v2484_v3, 1  ;;  %v730_v57 = vperm.slane %v2484_v3, 6 }
 0x126   : > { %v567_v15 = vadd.f32 %v566_v36, %v552_v33  ;;  %v575_v16 = vadd.f32 %v573_v50, %v560_v34  ;;  %v2509_v33 = vperm.slane %v2398_v44, 7  ;;  %v611_v36 = vmul.f32 %v2489_v6, %v609_v51 }
 0x127   : > { %v1518_v50 = vunpack.c.h.bf16 %v2354_v18  ;;  %v1526_v51 = vunpack.c.h.bf16 %v2367_v24 }
 0x128   : > { %v582_v5 = vadd.f32 %v581_v17, %v567_v15  ;;  %v590_v4 = vadd.f32 %v588_v40, %v575_v16  ;;  %v618_v15 = vmul.f32 %v1541_v52, %v2489_v6  ;;  %v2519_v16 = vperm.slane %v2484_v3, 0 }
 0x129   : > { %v744_v17 = vunpack.c.h.bf16 %v2478_v32  ;;  %v1577_v40 = vunpack.c.l.bf16 %v2503_v29 }
 0x12a   : > { %v597_v46 = vadd.f32 %v596_v35, %v582_v5  ;;  %v605_v41 = vadd.f32 %v603_v42, %v590_v4  ;;  %v626_v35 = vmul.f32 %v2509_v33, %v624_v53  ;;  %v633_v4 = vmul.f32 %v2924_v55, %v2509_v33 }
 0x12b   : > { %v2534_v5 = vperm.slane %v2484_v3, 2  ;;  %v529_v42 = vmul.f32 %v1518_v50, %v2424_v58  ;;  %v641_v53 = vmul.f32 %v2519_v16, %v639_v61  ;;  %v2550_v55 = vperm.slane %v2484_v3, 3 }
 0x12c   : > { %v612_v34 = vadd.f32 %v611_v36, %v597_v46  ;;  %v620_v19 = vadd.f32 %v618_v15, %v605_v41  ;;  %v544_v36 = vmul.f32 %v2925_v45, %v2427_v59  ;;  %v2927_v41 = vunpack.c.h.bf16 %v2370_v25 }
 0x12d   : > { %v648_v15 = vmul.f32 %v1549_v62, %v2519_v16  ;;  %v559_v59 = vmul.f32 %v1526_v51, %v2430_v60  ;;  %v2926_v45 = vunpack.c.h.bf16 %v2377_v30  ;;  %v656_v61 = vmul.f32 %v2524_v47, %v654_v63 }
 0x12e   : > { %v627_v37 = vadd.f32 %v626_v35, %v612_v34  ;;  %v635_v46 = vadd.f32 %v633_v4, %v620_v19  ;;  %v546_v58 = vadd.f32 %v544_v36, %v529_v42  ;;  %v663_v35 = vmul.f32 %v1553_v8, %v2524_v47 }
 0x12f   : > { %v671_v4 = vmul.f32 %v2534_v5, %v669_v9  ;;  %v574_v60 = vmul.f32 %v2927_v41, %v2436_v0  ;;  %v2928_v36 = vunpack.c.h.bf16 %v2380_v31  ;;  %v678_v48 = vmul.f32 %v1557_v22, %v2534_v5 }
 0x130   : > { %v642_v34 = vadd.f32 %v641_v53, %v627_v37  ;;  %v650_v19 = vadd.f32 %v648_v15, %v635_v46  ;;  %v561_v42 = vadd.f32 %v559_v59, %v546_v58  ;;  %v700_v63 = vperm.slane %v2484_v3, 4 }
 0x131   : > { %v686_v53 = vmul.f32 %v2550_v55, %v684_v23  ;;  %v589_v15 = vmul.f32 %v2926_v45, %v2456_v10  ;;  %v1542_v0 = vunpack.c.h.bf16 %v2389_v38  ;;  %v604_v23 = vmul.f32 %v2928_v36, %v2472_v27 }
 0x132   : > { %v657_v37 = vadd.f32 %v656_v61, %v642_v34  ;;  %v665_v46 = vadd.f32 %v663_v35, %v650_v19  ;;  %v576_v9 = vadd.f32 %v574_v60, %v561_v42  ;;  %v693_v34 = vmul.f32 %v1561_v26, %v2550_v55  ;;  %v773_v61 = vpop.permute.xlu2 %772 }
 0x133   : > { %v715_v19 = vperm.slane %v2484_v3, 5  ;;  %v1546_v10 = vunpack.c.h.bf16 %v2396_v43  ;;  %v745_v45 = vperm.slane %v2484_v3, 7 }
 0x134   : > { %v672_v58 = vadd.f32 %v671_v4, %v657_v37  ;;  %v680_v59 = vadd.f32 %v678_v48, %v665_v46  ;;  %v591_v35 = vadd.f32 %v589_v15, %v576_v9  ;;  %v2968_v4 = vunpack.c.l.bf16 %v2459_v12 }
 0x135   : > { %v2969_v46 = vunpack.c.l.bf16 %v2462_v13  ;;  %v619_v9 = vmul.f32 %v1542_v0, %v2489_v6  ;;  %v1550_v15 = vunpack.c.h.bf16 %v2407_v49 }
 0x136   : > { %v687_v42 = vadd.f32 %v686_v53, %v672_v58  ;;  %v695_v60 = vadd.f32 %v693_v34, %v680_v59  ;;  %v701_v37 = vmul.f32 %v700_v63, %v2968_v4  ;;  %v606_v41 = vadd.f32 %v604_v23, %v591_v35 }
 0x137   : > { %v708_v48 = vmul.f32 %v2969_v46, %v700_v63  ;;  %v716_v53 = vmul.f32 %v715_v19, %v714_v7  ;;  %v2970_v58 = vunpack.c.l.bf16 %v2475_v28  ;;  %v634_v4 = vmul.f32 %v1546_v10, %v2509_v33 }
 0x138   : > { %v702_v27 = vadd.f32 %v701_v37, %v687_v42  ;;  %v621_v34 = vadd.f32 %v619_v9, %v606_v41  ;;  %v1554_v35 = vunpack.c.h.bf16 %v2418_v56  ;;  %v2971_v46 = vunpack.c.l.bf16 %v2478_v32 }
 0x139   : > { %v710_v36 = vadd.f32 %v708_v48, %v695_v60  ;;  %v723_v59 = vmul.f32 %v2970_v58, %v715_v19  ;;  %v2972_v60 = vunpack.c.l.bf16 %v2492_v39  ;;  %v649_v41 = vmul.f32 %v1550_v15, %v2519_v16 }
 0x13a   : > { %v717_v23 = vadd.f32 %v716_v53, %v702_v27  ;;  %v731_v42 = vmul.f32 %v730_v57, %v2971_v46  ;;  %v636_v7 = vadd.f32 %v634_v4, %v621_v34  ;;  %v1558_v37 = vunpack.c.h.bf16 %v2439_v1  ;;  %v784_v4 = vpop.permute.xlu2 %783  ;;  %v1497_v1 = vld [vmem:[%s2331_s3 + $0x8] sm:$0xff]  }
 0x13b   : > { %v725_v6 = vadd.f32 %v723_v59, %v710_v36  ;;  %v738_v12 = vmul.f32 %v2972_v60, %v730_v57  ;;  %v746_v9 = vmul.f32 %v745_v45, %v744_v17  ;;  %v753_v36 = vmul.f32 %v1577_v40, %v745_v45  ;;  %v2623_v59 = vld [vmem:[%s2329_s10] sm:$0xff] }
 0x13c   : > { %v732_v48 = vadd.f32 %v731_v42, %v717_v23  ;;  %v651_v27 = vadd.f32 %v649_v41, %v636_v7  ;;  %v664_v53 = vmul.f32 %v1554_v35, %v2524_v47  ;;  %v2933_v58 = vunpack.c.h.bf16 %v2442_v2 }
 0x13d   : > { %v740_v33 = vadd.f32 %v738_v12, %v725_v6  ;;  %v679_v32 = vmul.f32 %v1558_v37, %v2534_v5  ;;  %v2932_v17 = vunpack.c.h.bf16 %v2462_v13  ;;  %v2931_v60 = vunpack.c.h.bf16 %v2475_v28 }
 0x13e   : > { %v747_v16 = vadd.f32 %v746_v9, %v732_v48  ;;  %v666_v23 = vadd.f32 %v664_v53, %v651_v27  ;;  %v694_v42 = vmul.f32 %v2933_v58, %v2550_v55  ;;  %v790_v12 = vmul.f32 %v2398_v44, %v784_v4  ;;  %v796_v27 = vpop.permute.xlu1 %795 }
 0x13f   : > { %v755_v34 = vadd.f32 %v753_v36, %v740_v33  ;;  %v709_v48 = vmul.f32 %v2932_v17, %v700_v63  ;;  %v2930_v33 = vunpack.c.h.bf16 %v2492_v39  ;;  %v724_v53 = vmul.f32 %v2931_v60, %v715_v19  ;;  %v810_v63 = vld [vmem:[%s2331_s3] sm:$0xff]  }
 0x140   : > { %v757_v46 = vsub.f32 %v2623_v59, %v747_v16  ;;  %v681_v47 = vadd.f32 %v679_v32, %v666_v23  ;;  %v2929_v44 = vunpack.c.h.bf16 %v2503_v29 }
 0x141   : > { %v768_v6 = vsub.f32 %v755_v34, %v2344_v11  ;;  %v739_v4 = vmul.f32 %v2930_v33, %v730_v57 }
 0x142   : > { %v758_v5 = vmul.f32 %v757_v46, %v757_v46  ;;  %v696_v41 = vadd.f32 %v694_v42, %v681_v47  ;;  %v754_v46 = vmul.f32 %v2929_v44, %v745_v45  ;;  %v1452_v47 = vld [vmem:[%s2331_s3 + $0x8] sm:$0xff]   ;;  %v811_v42 = vunpack.c.l.bf16 %v810_v63 }
 0x143   : > { %v780_v7 = vmul.f32 %v773_v61, %v768_v6  ;;  %v837_v57 = vunpack.c.l.bf16 %v1452_v47 }
 0x144   : > { %v759_v36 = vrot.slane %v758_v5, 4  ;;  %v711_v55 = vadd.f32 %v709_v48, %v696_v41  ;;  %v788_v41 = vpop.permute.xlu0 %787  ;;  %v778_v48 = vpop.permute.xlu2 %777 }
 0x145   : > { %v792_v9 = vadd.f32 %v790_v12, %v780_v7  ;;  %v824_v12 = vunpack.c.h.bf16 %v810_v63  ;;  %v2974_v63 = vunpack.c.l.bf16 %v2354_v18 }
 0x146   : > { %v760_v16 = vadd.f32 %v759_v36, %v758_v5  ;;  %v726_v34 = vadd.f32 %v724_v53, %v711_v55  ;;  %v850_v55 = vunpack.c.h.bf16 %v1452_v47  ;;  %v1458_v53 = vld [vmem:[%s2331_s3 + $0x10] sm:$0xff]   ;;  %v2975_v47 = vunpack.c.l.bf16 %v2361_v21 }
 0x147   : > { %v802_v61 = vadd.f32 %v796_v27, %v792_v9  ;;  %v863_v44 = vunpack.c.l.bf16 %v1458_v53 }
 0x148   : > { %v761_v32 = vrot.slane %v760_v16, 2  ;;  %v741_v6 = vadd.f32 %v739_v4, %v726_v34 }
 0x149   : > { %v804_v23 = vmul.f32 %v802_v61, %v2358_v20 }
 0x14a   : > { %v762_v7 = vadd.f32 %v761_v32, %v760_v16  ;;  %v756_v5 = vadd.f32 %v754_v46, %v741_v6  ;;  %v791_v6 = vmul.f32 %v2484_v3, %v788_v41  ;;  %v2976_v3 = vunpack.c.l.bf16 %v2367_v24  ;;  %v800_v41 = vpop.permute.xlu1 %799 }
 0x14b   : > { %v2651_v19 = vclamps-f32 %v804_v23, 1.0 }
 0x14c   : > { %v763_v9 = vrot.slane %v762_v7, 1  ;;  %v769_v45 = vsub.f32 %v756_v5, %v2349_v14 }
 0x14d   : > { %v812_v36 = vperm.slane %v2651_v19, 0  ;;  %v2655_v27 = vperm.slane %v2651_v19, 1  ;;  %v2665_v61 = vperm.slane %v2651_v19, 2  ;;  %v2668_v16 = vperm.slane %v2651_v19, 3 }
 0x14e   : > { %v764_v34 = vadd.f32 %v763_v9, %v762_v7  ;;  %v781_v46 = vmul.f32 %v778_v48, %v769_v45  ;;  %v2680_v7 = vperm.slane %v2651_v19, 4  ;;  %v1464_v9 = vld [vmem:[%s2331_s3 + $0x18] sm:$0xff]   ;;  %v876_v48 = vunpack.c.h.bf16 %v1458_v53 }
 0x14f   : > { %v813_v4 = vmul.f32 %v812_v36, %v811_v42  ;;  %v819_v23 = vmul.f32 %v2974_v63, %v812_v36  ;;  %v826_v32 = vmul.f32 %v2655_v27, %v824_v12  ;;  %v832_v5 = vmul.f32 %v2975_v47, %v2655_v27 }
 0x150   : > { %765 = vst [vmem:[%s2661_s14] sm:$0x1] %v764_v34  ;;  %v839_v60 = vmul.f32 %v2665_v61, %v837_v57  ;;  %v793_v42 = vadd.f32 %v791_v6, %v781_v46  ;;  %v845_v12 = vmul.f32 %v2976_v3, %v2665_v61  ;;  %v852_v47 = vmul.f32 %v2668_v16, %v850_v55 }
 0x151   : > { %v827_v33 = vadd.f32 %v826_v32, %v813_v4  ;;  %v834_v63 = vadd.f32 %v832_v5, %v819_v23  ;;  %v2688_v34 = vperm.slane %v2651_v19, 5  ;;  %v2977_v32 = vunpack.c.l.bf16 %v2370_v25 }
 0x152   : > { %v803_v57 = vadd.f32 %v800_v41, %v793_v42  ;;  %v889_v46 = vunpack.c.l.bf16 %v1464_v9  ;;  %v865_v5 = vmul.f32 %v2680_v7, %v863_v44  ;;  %v2695_v3 = vperm.slane %v2651_v19, 6 }
 0x153   : > { %v840_v45 = vadd.f32 %v839_v60, %v827_v33  ;;  %v847_v4 = vadd.f32 %v845_v12, %v834_v63  ;;  %v858_v6 = vmul.f32 %v2977_v32, %v2668_v16  ;;  %v1470_v33 = vld [vmem:[%s2331_s3 + $0x20] sm:$0xff]   ;;  %v2978_v53 = vunpack.c.l.bf16 %v2377_v30 }
 0x154   : > { %v805_v60 = vmul.f32 %v803_v57, %v2414_v54  ;;  %v902_v63 = vunpack.c.h.bf16 %v1464_v9  ;;  %v878_v41 = vmul.f32 %v2688_v34, %v876_v48  ;;  %v2704_v32 = vperm.slane %v2651_v19, 7 }
 0x155   : > { %v853_v23 = vadd.f32 %v852_v47, %v840_v45  ;;  %v860_v55 = vadd.f32 %v858_v6, %v847_v4  ;;  %v871_v42 = vmul.f32 %v2978_v53, %v2680_v7  ;;  %v2979_v47 = vunpack.c.l.bf16 %v2380_v31  ;;  %v1476_v6 = vld [vmem:[%s2331_s3 + $0x28] sm:$0xff]  }
 0x156   : > { %v2706_v45 = vclamps-f32 %v805_v60, 1.0  ;;  %v915_v4 = vunpack.c.l.bf16 %v1470_v33  ;;  %v891_v53 = vmul.f32 %v2695_v3, %v889_v46  ;;  %v897_v48 = vmul.f32 %v1541_v52, %v2695_v3 }
 0x157   : > { %v866_v12 = vadd.f32 %v865_v5, %v853_v23  ;;  %v873_v44 = vadd.f32 %v871_v42, %v860_v55  ;;  %v884_v57 = vmul.f32 %v2979_v47, %v2688_v34  ;;  %v928_v5 = vunpack.c.h.bf16 %v1470_v33 }
 0x158   : > { %v2717_v23 = vperm.slane %v2706_v45, 0  ;;  %v904_v55 = vmul.f32 %v2704_v32, %v902_v63  ;;  %v2721_v42 = vperm.slane %v2706_v45, 1  ;;  %v941_v47 = vunpack.c.l.bf16 %v1476_v6 }
 0x159   : > { %v879_v17 = vadd.f32 %v878_v41, %v866_v12  ;;  %v886_v9 = vadd.f32 %v884_v57, %v873_v44  ;;  %v2980_v46 = vunpack.c.l.bf16 %v2396_v43  ;;  %v820_v52 = vmul.f32 %v1518_v50, %v812_v36  ;;  %v1482_v41 = vld [vmem:[%s2331_s3 + $0x30] sm:$0xff]  }
 0x15a   : > { %v917_v33 = vmul.f32 %v2717_v23, %v915_v4  ;;  %v2981_v63 = vunpack.c.h.bf16 %v2361_v21  ;;  %v930_v50 = vmul.f32 %v2721_v42, %v928_v5  ;;  %v2741_v36 = vperm.slane %v2706_v45, 3  ;;  %v1488_v21 = vld [vmem:[%s2331_s3 + $0x38] sm:$0xff]  }
 0x15b   : > { %v892_v60 = vadd.f32 %v891_v53, %v879_v17  ;;  %v899_v58 = vadd.f32 %v897_v48, %v886_v9  ;;  %v910_v12 = vmul.f32 %v2980_v46, %v2704_v32  ;;  %v2731_v17 = vperm.slane %v2706_v45, 2 }
 0x15c   : > { %v833_v57 = vmul.f32 %v2981_v63, %v2655_v27  ;;  %v923_v9 = vmul.f32 %v1549_v62, %v2717_v23  ;;  %v954_v48 = vunpack.c.h.bf16 %v1476_v6  ;;  %v967_v4 = vunpack.c.l.bf16 %v1482_v41 }
 0x15d   : > { %v905_v44 = vadd.f32 %v904_v55, %v892_v60  ;;  %v912_v53 = vadd.f32 %v910_v12, %v899_v58  ;;  %v936_v55 = vmul.f32 %v1553_v8, %v2721_v42  ;;  %v943_v58 = vmul.f32 %v2731_v17, %v941_v47 }
 0x15e   : > { %v2749_v46 = vperm.slane %v2706_v45, 4  ;;  %v835_v62 = vadd.f32 %v833_v57, %v820_v52  ;;  %v980_v6 = vunpack.c.h.bf16 %v1482_v41  ;;  %v949_v5 = vmul.f32 %v1557_v22, %v2731_v17 }
 0x15f   : > { %v918_v18 = vadd.f32 %v917_v33, %v905_v44  ;;  %v925_v60 = vadd.f32 %v923_v9, %v912_v53  ;;  %v956_v33 = vmul.f32 %v2741_v36, %v954_v48  ;;  %v2756_v63 = vperm.slane %v2706_v45, 5 }
 0x160   : > { %v846_v8 = vmul.f32 %v1526_v51, %v2665_v61  ;;  %v993_v47 = vunpack.c.l.bf16 %v1488_v21  ;;  %v962_v52 = vmul.f32 %v1561_v26, %v2741_v36  ;;  %v2982_v41 = vunpack.c.h.bf16 %v2370_v25 }
 0x161   : > { %v931_v27 = vadd.f32 %v930_v50, %v918_v18  ;;  %v938_v12 = vadd.f32 %v936_v55, %v925_v60  ;;  %v969_v9 = vmul.f32 %v2749_v46, %v967_v4  ;;  %v2769_v48 = vperm.slane %v2706_v45, 6 }
 0x162   : > { %v859_v22 = vmul.f32 %v2982_v41, %v2668_v16  ;;  %v848_v18 = vadd.f32 %v846_v8, %v835_v62  ;;  %v1006_v50 = vunpack.c.h.bf16 %v1488_v21  ;;  %v2983_v51 = vunpack.c.l.bf16 %v2462_v13  ;;  %v1034_v8 = vpop.permute.xlu2 %1033 }
 0x163   : > { %v944_v44 = vadd.f32 %v943_v58, %v931_v27  ;;  %v951_v53 = vadd.f32 %v949_v5, %v938_v12  ;;  %v2984_v26 = vunpack.c.h.bf16 %v2377_v30  ;;  %v982_v25 = vmul.f32 %v2756_v63, %v980_v6 }
 0x164   : > { %v975_v61 = vmul.f32 %v2983_v51, %v2749_v46  ;;  %v2779_v16 = vperm.slane %v2706_v45, 7  ;;  %v861_v4 = vadd.f32 %v859_v22, %v848_v18  ;;  %v2985_v21 = vunpack.c.l.bf16 %v2475_v28 }
 0x165   : > { %v957_v57 = vadd.f32 %v956_v33, %v944_v44  ;;  %v964_v24 = vadd.f32 %v962_v52, %v951_v53  ;;  %v872_v60 = vmul.f32 %v2984_v26, %v2680_v7  ;;  %v995_v12 = vmul.f32 %v2769_v48, %v993_v47 }
 0x166   : > { %v988_v58 = vmul.f32 %v2985_v21, %v2756_v63  ;;  %v2986_v30 = vunpack.c.h.bf16 %v2380_v31  ;;  %v2987_v6 = vunpack.c.l.bf16 %v2492_v39  ;;  %v1008_v52 = vmul.f32 %v2779_v16, %v1006_v50 }
 0x167   : > { %v970_v55 = vadd.f32 %v969_v9, %v957_v57  ;;  %v977_v27 = vadd.f32 %v975_v61, %v964_v24  ;;  %v874_v5 = vadd.f32 %v872_v60, %v861_v4  ;;  %v898_v22 = vmul.f32 %v1542_v0, %v2695_v3  ;;  %v1045_v3 = vpop.permute.xlu1 %1044 }
 0x168   : > { %v885_v7 = vmul.f32 %v2986_v30, %v2688_v34  ;;  %v1001_v33 = vmul.f32 %v2987_v6, %v2769_v48  ;;  %v1014_v31 = vmul.f32 %v1577_v40, %v2779_v16  ;;  %v911_v9 = vmul.f32 %v1546_v10, %v2704_v32 }
 0x169   : > { %v983_v62 = vadd.f32 %v982_v25, %v970_v55  ;;  %v990_v44 = vadd.f32 %v988_v58, %v977_v27  ;;  %v924_v38 = vmul.f32 %v1550_v15, %v2717_v23  ;;  %v937_v61 = vmul.f32 %v1554_v35, %v2721_v42  ;;  %v1644_v42 = vld [vmem:[%s2331_s3] sm:$0xff]  }
 0x16a   : > { %v887_v41 = vadd.f32 %v885_v7, %v874_v5  ;;  %v1051_v43 = vmul.f32 %v2651_v19, %v1045_v3  ;;  %v950_v49 = vmul.f32 %v1558_v37, %v2731_v17  ;;  %v1057_v23 = vpop.permute.xlu2 %1056  ;;  %v2988_v55 = vunpack.c.h.bf16 %v2442_v2  ;;  %v1499_v7 = vld [vmem:[%s2331_s3 + $0x10] sm:$0xff]  }
 0x16b   : > { %v996_v53 = vadd.f32 %v995_v12, %v983_v62  ;;  %v1003_v47 = vadd.f32 %v1001_v33, %v990_v44  ;;  %v2989_v4 = vunpack.c.h.bf16 %v2462_v13  ;;  %v1645_v58 = vunpack.c.l.bf16 %v1644_v42 }
 0x16c   : > { %v900_v57 = vadd.f32 %v898_v22, %v887_v41  ;;  %v963_v25 = vmul.f32 %v2988_v55, %v2741_v36  ;;  %v1646_v62 = vunpack.c.h.bf16 %v1644_v42  ;;  %v2990_v2 = vunpack.c.h.bf16 %v2475_v28  ;;  %v1503_v55 = vld [vmem:[%s2331_s3 + $0x20] sm:$0xff]  }
 0x16d   : > { %v1009_v34 = vadd.f32 %v1008_v52, %v996_v53  ;;  %v1016_v18 = vadd.f32 %v1014_v31, %v1003_v47  ;;  %v976_v27 = vmul.f32 %v2989_v4, %v2749_v46  ;;  %v1082_v30 = vunpack.c.l.bf16 %v1497_v1  ;;  %v1505_v4 = vld [vmem:[%s2331_s3 + $0x28] sm:$0xff]  }
 0x16e   : > { %v913_v50 = vadd.f32 %v911_v9, %v900_v57  ;;  %v989_v36 = vmul.f32 %v2990_v2, %v2756_v63  ;;  %v1087_v33 = vunpack.c.h.bf16 %v1497_v1  ;;  %v2991_v28 = vunpack.c.h.bf16 %v2492_v39  ;;  %v1039_v39 = vpop.permute.xlu0 %1038 }
 0x16f   : > { %v1018_v24 = vsub.f32 %v2623_v59, %v1009_v34  ;;  %v1029_v0 = vsub.f32 %v1016_v18, %v2344_v11  ;;  %v1092_v41 = vunpack.c.l.bf16 %v1499_v7  ;;  %v2992_v22 = vunpack.c.h.bf16 %v2503_v29 }
 0x170   : > { %v926_v40 = vadd.f32 %v924_v38, %v913_v50  ;;  %v1002_v63 = vmul.f32 %v2991_v28, %v2769_v48  ;;  %v1097_v18 = vunpack.c.h.bf16 %v1499_v7  ;;  %v1501_v50 = vld [vmem:[%s2331_s3 + $0x18] sm:$0xff]   ;;  %v1112_v42 = vunpack.c.l.bf16 %v1503_v55 }
 0x171   : > { %v1019_v51 = vmul.f32 %v1018_v24, %v1018_v24  ;;  %v1041_v10 = vmul.f32 %v1034_v8, %v1029_v0  ;;  %v1015_v47 = vmul.f32 %v2992_v22, %v2779_v16  ;;  %v1049_v24 = vpop.permute.xlu1 %1048  ;;  %v1102_v16 = vunpack.c.l.bf16 %v1501_v50 }
 0x172   : > { %v939_v26 = vadd.f32 %v937_v61, %v926_v40  ;;  %v1052_v29 = vmul.f32 %v2706_v45, %v1049_v24  ;;  %v1117_v1 = vunpack.c.h.bf16 %v1503_v55 }
 0x173   : > { %v1020_v32 = vrot.slane %v1019_v51, 4  ;;  %v1053_v15 = vadd.f32 %v1051_v43, %v1041_v10 }
 0x174   : > { %v952_v60 = vadd.f32 %v950_v49, %v939_v26  ;;  %v1061_v49 = vpop.permute.xlu2 %1060 }
 0x175   : > { %v1021_v11 = vadd.f32 %v1020_v32, %v1019_v51  ;;  %v1063_v56 = vadd.f32 %v1057_v23, %v1053_v15  ;;  %v1107_v23 = vunpack.c.h.bf16 %v1501_v50 }
 0x176   : > { %v965_v19 = vadd.f32 %v963_v25, %v952_v60 }
 0x177   : > { %v1022_v35 = vrot.slane %v1021_v11, 2  ;;  %v1065_v37 = vmul.f32 %v1063_v56, %v2358_v20 }
 0x178   : > { %v978_v21 = vadd.f32 %v976_v27, %v965_v19 }
 0x179   : > { %v1023_v17 = vadd.f32 %v1022_v35, %v1021_v11  ;;  %v1494_v12 = vclamps-f32 %v1065_v37, 1.0 }
 0x17a   : > { %v991_v6 = vadd.f32 %v989_v36, %v978_v21 }
 0x17b   : > { %v1024_v5 = vrot.slane %v1023_v17, 1  ;;  %v1073_v44 = vperm.slane %v1494_v12, 0  ;;  %v1078_v13 = vperm.slane %v1494_v12, 1  ;;  %v1083_v46 = vperm.slane %v1494_v12, 2  ;;  %1160 = vst [vmem:[%s2827_s27] sm:$0xff] %v1494_v12 }
 0x17c   : > { %v1088_v52 = vperm.slane %v1494_v12, 3  ;;  %v1093_v57 = vperm.slane %v1494_v12, 4  ;;  %v1004_v9 = vadd.f32 %v1002_v63, %v991_v6  ;;  %v1098_v3 = vperm.slane %v1494_v12, 5 }
 0x17d   : > { %v1025_v20 = vadd.f32 %v1024_v5, %v1023_v17  ;;  %v1074_v8 = vmul.f32 %v1645_v58, %v1073_v44  ;;  %v1079_v53 = vmul.f32 %v1646_v62, %v1078_v13  ;;  %v1084_v34 = vmul.f32 %v1083_v46, %v1082_v30 }
 0x17e   : > { %v1089_v0 = vmul.f32 %v1088_v52, %v1087_v33  ;;  %v1017_v51 = vadd.f32 %v1015_v47, %v1004_v9  ;;  %v1094_v40 = vmul.f32 %v1093_v57, %v1092_v41  ;;  %v1099_v10 = vmul.f32 %v1098_v3, %v1097_v18 }
 0x17f   : > { %1026 = vst [vmem:[%s2661_s14 + $0x1] sm:$0x1] %v1025_v20  ;;  %v1080_v31 = vadd.f32 %v1079_v53, %v1074_v8  ;;  %v1103_v32 = vperm.slane %v1494_v12, 6  ;;  %v1108_v60 = vperm.slane %v1494_v12, 7 }
 0x180   : > { %v1030_v61 = vsub.f32 %v1017_v51, %v2349_v14 }
 0x181   : > { %v1085_v38 = vadd.f32 %v1084_v34, %v1080_v31  ;;  %v1104_v14 = vmul.f32 %v1103_v32, %v1102_v16  ;;  %v1109_v35 = vmul.f32 %v1108_v60, %v1107_v23 }
 0x182   : > { %v1042_v26 = vmul.f32 %v1039_v39, %v1030_v61 }
 0x183   : > { %v1090_v48 = vadd.f32 %v1089_v0, %v1085_v38 }
 0x184   : > { %v1054_v11 = vadd.f32 %v1052_v29, %v1042_v26 }
 0x185   : > { %v1095_v43 = vadd.f32 %v1094_v40, %v1090_v48 }
 0x186   : > { %v1064_v45 = vadd.f32 %v1061_v49, %v1054_v11 }
 0x187   : > { %v1100_v15 = vadd.f32 %v1099_v10, %v1095_v43 }
 0x188   : > { %v1066_v56 = vmul.f32 %v1064_v45, %v2414_v54 }
 0x189   : > { %v1105_v25 = vadd.f32 %v1104_v14, %v1100_v15 }
 0x18a   : > { %v1495_v19 = vclamps-f32 %v1066_v56, 1.0 }
 0x18b   : > { %v1110_v27 = vadd.f32 %v1109_v35, %v1105_v25 }
 0x18c   : > { %v1113_v37 = vperm.slane %v1495_v19, 0  ;;  %v1118_v17 = vperm.slane %v1495_v19, 1  ;;  %1161 = vst [vmem:[%s2827_s27 + $0x8] sm:$0xff] %v1495_v19 }
 0x18d   : > { %1991 = shalt.err (!%p1988_p3)
}
 0x18e   : > { %s2058_s20 = smov 128   ;;  %s2059_s10 = smov 256   ;;  %v1122_v54 = vunpack.c.l.bf16 %v1505_v4  ;;  %v1114_v21 = vmul.f32 %v1113_v37, %v1112_v42  ;;  %v1123_v58 = vperm.slane %v1495_v19, 2  ;;  %v1507_v62 = vld [vmem:[%s2331_s3 + $0x30] sm:$0xff]   ;;  %v1127_v12 = vunpack.c.h.bf16 %v1505_v4  ;;  %v1509_v46 = vld [vmem:[%s2331_s3 + $0x38] sm:$0xff]  }
 0x18f   : > { %s2060_s7 = smov 8   ;;  %v1119_v36 = vmul.f32 %v1118_v17, %v1117_v1  ;;  %v1128_v5 = vperm.slane %v1495_v19, 3  ;;  %v1132_v30 = vunpack.c.l.bf16 %v1507_v62  ;;  %v1133_v13 = vperm.slane %v1495_v19, 4 }
 0x190   : > { %1691 = dma.vmem_to_hbm [thread:$0]  (%p2227_p7), %s2847_s0, 256, %s2849_s23, %s1163_s24, %s2058_s20, %s2059_s10, %s2060_s7   ;;  %v1115_v2 = vadd.f32 %v1114_v21, %v1110_v27  ;;  %v1124_v44 = vmul.f32 %v1123_v58, %v1122_v54  ;;  %v1137_v6 = vunpack.c.h.bf16 %v1507_v62  ;;  %v1138_v8 = vperm.slane %v1495_v19, 5 }
 0x191   : > { %v1129_v33 = vmul.f32 %v1128_v5, %v1127_v12  ;;  %v1142_v53 = vunpack.c.l.bf16 %v1509_v46  ;;  %v1134_v28 = vmul.f32 %v1133_v13, %v1132_v30  ;;  %v1143_v63 = vperm.slane %v1495_v19, 6 }
 0x192   : > { %v1120_v7 = vadd.f32 %v1119_v36, %v1115_v2  ;;  %v1147_v41 = vunpack.c.h.bf16 %v1509_v46  ;;  %v1139_v47 = vmul.f32 %v1138_v8, %v1137_v6  ;;  %v1148_v31 = vperm.slane %v1495_v19, 7 }
 0x193   : > { %v1144_v57 = vmul.f32 %v1143_v63, %v1142_v53 }
 0x194   : > { %v1125_v20 = vadd.f32 %v1124_v44, %v1120_v7  ;;  %v1149_v18 = vmul.f32 %v1148_v31, %v1147_v41 }
 0x196   : > { %v1130_v52 = vadd.f32 %v1129_v33, %v1125_v20 }
 0x198   : > { %v1135_v22 = vadd.f32 %v1134_v28, %v1130_v52 }
 0x19a   : > { %v1140_v34 = vadd.f32 %v1139_v47, %v1135_v22 }
 0x19c   : > { %v1145_v9 = vadd.f32 %v1144_v57, %v1140_v34 }
 0x19e   : > { %v1150_v24 = vadd.f32 %v1149_v18, %v1145_v9 }
 0x1a0   : > { %v1151_v50 = vsub.f32 %v2623_v59, %v1150_v24 }
 0x1a2   : > { %v1152_v38 = vmul.f32 %v1151_v50, %v1151_v50 }
 0x1a4   : > { %v1153_v0 = vrot.slane %v1152_v38, 4 }
 0x1a6   : > { %v1154_v3 = vadd.f32 %v1153_v0, %v1152_v38 }
 0x1a8   : > { %v1155_v51 = vrot.slane %v1154_v3, 2 }
 0x1aa   : > { %v1156_v39 = vadd.f32 %v1155_v51, %v1154_v3 }
 0x1ac   : > { %v1157_v48 = vrot.slane %v1156_v39, 1 }
 0x1ae   : > { %v1158_v40 = vadd.f32 %v1157_v48, %v1156_v39 }
 0x1b0   : > { %1159 = vst [vmem:[%s2661_s14 + $0x2] sm:$0x1] %v1158_v40 }
 0x1b1 PF: > { %s2995_s3 = sld [smem:[#allocation19_spill]] }
 0x1b2   : > { %s2997_s19 = sld [smem:[#allocation21_spill]] }
 0x1b7   : > { %s1198_s11 = sand.u32 1, %s2995_s3  }
 0x1b8   : > { %p2998_p7 = scmp.ge.s32.totalorder %s2997_s19, 2  ;;  %s1199_s1 = scalar_lea.sflag [#allocation4], %s1198_s11 }
 0x1ba   : > { %p1714_p10 = pnand %p2998_p7, %p2231_p9 }
 0x1bc   : > { %p1715_p0 = pneg %p1714_p10 }
 0x1be   : > { %2025 = dma.done.wait (%p1715_p0), %s1199_s1, 256  }
 0x1bf   : > { %2027 = vsyncadd (%p1715_p0), %s1199_s1, 4294967040  ;;  %s2999_s27 = sld [smem:[#allocation22_spill]]  ;;  %s3002_s24 = smov %s2034_s25 }
 0x1c0   : > { %s3000_s15 = sld [smem:[#allocation20_spill]] }
 0x1c1   : > { %s3001_s26 = sld [smem:[#allocation23_spill]] }
 0x1c5   : > { %p28_p6 = scmp.ge.s32.totalorder %s2999_s27, 4  }
 0x1c6   : > { %s3003_s25 = smov %s3000_s15 }
 0x1c7   :  { %30 = sbr.rel (!%p28_p6) target bundleno = 17 (0x11), region = 183 }
 0x1cc   :  { %1212 = vsyncpa [#allocation3], 1 }
 0x1cd   :  { %1214 = vsyncpa [#allocation3 + $0x1], 1 }
 0x1ce   :  { %1215 = vsyncpa [#allocation6], 1 }
 0x1cf   :  { %1217 = vsyncpa [#allocation6 + $0x1], 1 }
 0x1d0   :  { %1218 = vsyncpa [#allocation9], 1 }
 0x1d1   :  { %1220 = vsyncpa [#allocation9 + $0x1], 1 }
 0x1d2   :  { %1221 = vsyncpa [#allocation12], 1 }
 0x1d3   :  { %1222 = vsyncpa [#allocation4], 1 }
 0x1d4   :  { %1224 = vsyncpa [#allocation4 + $0x1], 1 }

</bundles_post_ra>
